<compile_context>
chip_gen: v6e
topology: v6e:2x2x1
jax: 0.10.0
libtpu: 0.0.40
codegen_flags: <defaults>
</compile_context>

<pallas_src>
import functools

import jax
import jax.numpy as jnp
from jax.experimental import pallas as pl
from jax.experimental.pallas import tpu as pltpu


# ---------------------------------------------------------------------------
# Fused forward kernel (one grid point = one batch tile of 8)
# ---------------------------------------------------------------------------
def _fused_cnn_ddqn_kernel(p1_ref, w1_ref, b1_ref, w2_ref, b2_ref, w3_ref, b3_ref,
                           fc1_ref, fc1b_ref, fc2_ref, qb_ref, o_ref, *,
                           bt, rh, rw, oh2, ow2, oh3, ow3, k3):
    f32, bf16 = jnp.float32, jnp.bfloat16

    def dense(lhs, w_ref, b_ref, relu):
        # bf16 x bf16 operands, f32 accumulation on the MXU.
        y = jnp.dot(lhs, w_ref[...], preferred_element_type=f32) + b_ref[...]
        return jnp.maximum(y, 0.0) if relu else y

    def im2col_s1(h, gw, oh, ow, kh, kw):
        """im2col of a stride-1 conv over a grid whose rows are laid out (row, col, b).

        One row-concat per tap (aligned, contiguous slices of ow*bt rows), then one
        channel-concat across taps -> (oh*ow*bt, kh*kw*C) bf16 LHS for a single matmul.
        """
        taps = []
        for i in range(kh):
            for j in range(kw):
                rows = [h[((a + i) * gw + j) * bt:((a + i) * gw + j + ow) * bt, :]
                        for a in range(oh)]
                taps.append(rows[0] if len(rows) == 1 else jnp.concatenate(rows, axis=0))
        return taps[0] if len(taps) == 1 else jnp.concatenate(taps, axis=1)

    # conv1: one K = k1*k1*Cin matmul (x/255 already folded into w1).
    h1 = dense(p1_ref[...], w1_ref, b1_ref, relu=True).astype(bf16)   # (4*rh*rw*bt, 32)

    # space-to-depth by 2: (2rh, 2rw, 32) grid -> (rh, rw, 128).  Rows of each group are
    # already contiguous (p1 was ordered (group, R, C, b)) -> 4 slices + 1 lane concat.
    qrows = rh * rw * bt
    s2d = jnp.concatenate([h1[g * qrows:(g + 1) * qrows, :] for g in range(4)], axis=1)

    # conv2 (k=4, s=2) == stride-1 k=2 conv over the s2d grid: one K=512 matmul.
    lhs2 = im2col_s1(s2d, rw, oh2, ow2, 2, 2)                          # (oh2*ow2*bt, 512)
    h2 = dense(lhs2, w2_ref, b2_ref, relu=True).astype(bf16)           # (oh2*ow2*bt, 64)

    # conv3 (k=3, s=1): one K = 9*64 matmul.
    lhs3 = im2col_s1(h2, ow2, oh3, ow3, k3, k3)                        # (oh3*ow3*bt, 576)
    h3 = dense(lhs3, w3_ref, b3_ref, relu=True).astype(bf16)           # (oh3*ow3*bt, 64)

    # fc1 == full-window "conv" over the (oh3, ow3) grid: one K = oh3*ow3*64 matmul.
    lhs4 = im2col_s1(h3, ow3, 1, 1, oh3, ow3)                          # (bt, oh3*ow3*64)
    h4 = dense(lhs4, fc1_ref, fc1b_ref, relu=True).astype(bf16)        # (bt, 512)

    # fc2 (bias-free) + external DDQN bias; lane-dense (bt, 128*ceil(A/128)) f32 store.
    o_ref[...] = dense(h4, fc2_ref, qb_ref, relu=False)


# ---------------------------------------------------------------------------
# One-time weight repacking (hoisted out of the per-call path)
# ---------------------------------------------------------------------------
def prepare_params(params, input_shape):
    f32, bf16 = jnp.float32, jnp.bfloat16
    c_in, H, W = input_shape
    k1, s1 = params["w1"].shape[2], 4
    k2, s2 = params["w2"].shape[2], 2
    k3, s3 = params["w3"].shape[2], 1
    assert (k1, k2, s2, k3, s3) == (8, 4, 2, 3, 1)   # fixed by the module

    h1g = (H - k1) // s1 + 1
    w1g = (W - k1) // s1 + 1
    rh, rw = h1g // 2, w1g // 2            # space-to-depth grid feeding conv2
    oh2, ow2 = rh - 1, rw - 1              # == (h1g-4)//2+1, (w1g-4)//2+1
    oh3, ow3 = oh2 - k3 + 1, ow2 - k3 + 1

    oc1 = params["w1"].shape[0]
    oc2, ic2 = params["w2"].shape[0], params["w2"].shape[1]
    oc3, ic3 = params["w3"].shape[0], params["w3"].shape[1]

    # conv1 as a matmul, (kh, kw, cin) patch-column order, with the 1/255 scale folded in.
    w1_mat = (jnp.transpose(params["w1"].astype(f32), (2, 3, 1, 0))
              .reshape(k1 * k1 * c_in, oc1) / 255.0).astype(bf16)
    # conv2 repacked for the space-to-depth formulation:
    #   LHS col = ((i'*2 + j')*4 + (di*2 + dj))*ic2 + c  <->  kernel tap (2i'+di, 2j'+dj).
    w2_mat = (params["w2"].astype(f32)
              .reshape(oc2, ic2, 2, 2, 2, 2)          # (O, I, i', di, j', dj)
              .transpose(2, 4, 3, 5, 1, 0)            # (i', j', di, dj, I, O)
              .reshape(16 * ic2, oc2)).astype(bf16)
    w3_mat = (jnp.transpose(params["w3"].astype(f32), (2, 3, 1, 0))
              .reshape(k3 * k3 * ic3, oc3)).astype(bf16)

    nh = params["fc1_w"].shape[1]
    # fc1 rows reordered from the NCHW flatten order (c, i, j) to the kernel's (i, j, c).
    fc1_mat = (params["fc1_w"].astype(f32)
               .reshape(oc3, oh3, ow3, nh)
               .transpose(1, 2, 0, 3)
               .reshape(oh3 * ow3 * oc3, nh)).astype(bf16)

    A = params["fc2_w"].shape[1]
    Ap = ((A + 127) // 128) * 128          # lane-dense Q head
    fc2_mat = jnp.zeros((nh, Ap), bf16).at[:, :A].set(params["fc2_w"].astype(bf16))
    qb = jnp.zeros((1, Ap), f32).at[:, :A].set(params["q_bias"].astype(f32))

    return {
        "w1": w1_mat, "b1": params["b1"].reshape(1, -1).astype(f32),
        "w2": w2_mat, "b2": params["b2"].reshape(1, -1).astype(f32),
        "w3": w3_mat, "b3": params["b3"].reshape(1, -1).astype(f32),
        "fc1": fc1_mat, "fc1b": params["fc1_b"].reshape(1, -1).astype(f32),
        "fc2": fc2_mat, "qb": qb,
        "dims": dict(k1=k1, s1=s1, k3=k3, rh=rh, rw=rw,
                     oh2=oh2, ow2=ow2, oh3=oh3, ow3=ow3),
        "num_actions": A,
    }


# ---------------------------------------------------------------------------
# Per-call wrapper: only conv1 im2col (depends on the raw input) runs here
# ---------------------------------------------------------------------------
def _conv1_patches(x_nhwc, d, n_bt):
    """conv1 im2col, rows ordered (batch-tile, s2d-group, R, C, batch-in-tile)."""
    k1, s1, rh, rw = d["k1"], d["s1"], d["rh"], d["rw"]
    bpad, H, W, C = x_nhwc.shape
    h1g = (H - k1) // s1 + 1
    w1g = (W - k1) // s1 + 1
    cols = []
    for i in range(k1):
        for j in range(k1):
            cols.append(x_nhwc[:, i:i + s1 * (h1g - 1) + 1:s1,
                               j:j + s1 * (w1g - 1) + 1:s1, :])
    p = jnp.stack(cols, axis=3).reshape(bpad, h1g, w1g, k1 * k1 * C)
    p = p[:, :2 * rh, :2 * rw, :]                      # trim odd edge (unused by conv2)
    p = p.reshape(n_bt, 8, rh, 2, rw, 2, k1 * k1 * C)
    p = jnp.transpose(p, (0, 3, 5, 2, 4, 1, 6))        # (tile, rpar, cpar, R, C, b, K)
    return p.reshape(n_bt * 4 * rh * rw * 8, k1 * k1 * C)


def cnn_ddqn_forward(packed, x_nchw):
    """Matches PyTorch CnnDDQN.forward: x/255 -> 3 conv+relu -> flatten -> fc -> +bias."""
    f32, bf16 = jnp.float32, jnp.bfloat16
    d = packed["dims"]
    BT = 8
    B = x_nchw.shape[0]
    n_bt = (B + BT - 1) // BT
    bpad = n_bt * BT

    x = jnp.transpose(x_nchw, (0, 2, 3, 1)).astype(bf16)   # pixels 0..255: exact in bf16
    if bpad != B:
        x = jnp.concatenate([x, jnp.zeros((bpad - B,) + x.shape[1:], bf16)], axis=0)

    p1 = _conv1_patches(x, d, n_bt)                    # (n_bt*rpt, k1*k1*c_in) bf16
    rpt = 4 * d["rh"] * d["rw"] * BT
    k1c = p1.shape[1]
    Ap = packed["qb"].shape[1]
    nh = packed["fc1"].shape[1]
    feat = packed["fc1"].shape[0]

    flops = 2 * bpad * (
        d["rh"] * d["rw"] * 4 * k1c * packed["w1"].shape[1]
        + d["oh2"] * d["ow2"] * packed["w2"].shape[0] * packed["w2"].shape[1]
        + d["oh3"] * d["ow3"] * packed["w3"].shape[0] * packed["w3"].shape[1]
        + feat * nh + nh * Ap)
    weight_bytes = sum(int(packed[k].size) * packed[k].dtype.itemsize
                       for k in ("w1", "b1", "w2", "b2", "w3", "b3",
                                 "fc1", "fc1b", "fc2", "qb"))
    bytes_accessed = int(p1.size) * 2 + weight_bytes + bpad * Ap * 4

    kernel = functools.partial(
        _fused_cnn_ddqn_kernel, bt=BT, rh=d["rh"], rw=d["rw"],
        oh2=d["oh2"], ow2=d["ow2"], oh3=d["oh3"], ow3=d["ow3"], k3=d["k3"])

    def full2(a):
        return pl.BlockSpec(tuple(a.shape), lambda i: (0, 0))

    q = pl.pallas_call(
        kernel,
        out_shape=jax.ShapeDtypeStruct((bpad, Ap), f32),
        grid=(n_bt,),
        in_specs=[
            pl.BlockSpec((rpt, k1c), lambda i: (i, 0)),
            full2(packed["w1"]), full2(packed["b1"]),
            full2(packed["w2"]), full2(packed["b2"]),
            full2(packed["w3"]), full2(packed["b3"]),
            full2(packed["fc1"]), full2(packed["fc1b"]),
            full2(packed["fc2"]), full2(packed["qb"]),
        ],
        out_specs=pl.BlockSpec((BT, Ap), lambda i: (i, 0)),
        compiler_params=pltpu.CompilerParams(
            dimension_semantics=("parallel",)),
        cost_estimate=pl.CostEstimate(flops=flops, transcendentals=0,
                                      bytes_accessed=bytes_accessed),
    )(p1, packed["w1"], packed["b1"], packed["w2"], packed["b2"],
      packed["w3"], packed["b3"], packed["fc1"], packed["fc1b"],
      packed["fc2"], packed["qb"])

    return q[:B, :packed["num_actions"]]


# ---------------------------------------------------------------------------
# Pure-JAX reference (correctness check only)
# ---------------------------------------------------------------------------
def reference_forward(params, x_nchw):
    f32 = jnp.float32
    x = x_nchw.astype(f32) / 255.0

    def conv(x, w, b, s):
        y = jax.lax.conv_general_dilated(
            x, w.astype(f32), (s, s), "VALID",
            dimension_numbers=("NCHW", "OIHW", "NCHW"))
        return jax.nn.relu(y + b[None, :, None, None])

    x = conv(x, params["w1"], params["b1"], 4)
    x = conv(x, params["w2"], params["b2"], 2)
    x = conv(x, params["w3"], params["b3"], 1)
    x = x.reshape(x.shape[0], -1)
    x = jax.nn.relu(jnp.dot(x, params["fc1_w"].astype(f32)) + params["fc1_b"])
    return jnp.dot(x, params["fc2_w"].astype(f32)) + params["q_bias"]


# ---------------------------------------------------------------------------
# Deterministic parameter init (synthetic; shapes follow the module __init__)
# ---------------------------------------------------------------------------
def init_params(key, input_shape, num_actions):
    c_in, h, w = input_shape
    ks = jax.random.split(key, 8)

    def rnd(k, shape, scale=0.05, dtype=jnp.bfloat16):
        return (scale * jax.random.normal(k, shape)).astype(dtype)

    h1 = (h - 8) // 4 + 1
    h2 = (h1 - 4) // 2 + 1
    h3 = h2 - 3 + 1
    w1 = (w - 8) // 4 + 1
    w2 = (w1 - 4) // 2 + 1
    w3 = w2 - 3 + 1
    feat = 64 * h3 * w3

    return {
        "w1": rnd(ks[0], (32, c_in, 8, 8)),
        "b1": rnd(ks[1], (32,), 0.01, jnp.float32),
        "w2": rnd(ks[2], (64, 32, 4, 4)),
        "b2": rnd(ks[3], (64,), 0.01, jnp.float32),
        "w3": rnd(ks[4], (64, 64, 3, 3)),
        "b3": rnd(ks[5], (64,), 0.01, jnp.float32),
        "fc1_w": rnd(ks[6], (feat, 512)),
        "fc1_b": jnp.zeros((512,), jnp.float32),
        "fc2_w": rnd(ks[7], (512, num_actions)),
        # module default: self.bias = nn.Parameter(torch.zeros(num_actions))
        "q_bias": jnp.zeros((num_actions,), jnp.float32),
    }


if __name__ == "__main__":
    key = jax.random.PRNGKey(0)
    k_param, k_x = jax.random.split(key)

    # Smallest spatial size compatible with the 8/4 -> 4/2 -> 3/1 conv stack is 36.
    input_shape = (4, 36, 36)   # (C, H, W)
    num_actions = 6
    batch = 2

    params = init_params(k_param, input_shape, num_actions)
    # Integer pixel frames 0..255 (exactly representable in bf16).
    x = jnp.round(jax.random.uniform(k_x, (batch,) + input_shape, jnp.float32, 0.0, 255.0))

    packed = prepare_params(params, input_shape)       # one-time weight repacking
    fwd = jax.jit(lambda xx: cnn_ddqn_forward(packed, xx))

    q = jax.block_until_ready(fwd(x))
    q_ref = jax.block_until_ready(reference_forward(params, x))

    assert q.shape == (batch, num_actions), q.shape
    err = float(jnp.max(jnp.abs(q - q_ref)))
    assert jnp.allclose(q, q_ref, atol=5e-3, rtol=5e-3), ("mismatch", err)
    print("KERNEL_OK")
</pallas_src>

<mosaic_0001>
module attributes {stable_mosaic.version = 11 : i64} {
  func.func @_fused_cnn_ddqn_kernel(%arg0: i32, %arg1: memref<512x256xbf16, #tpu.memory_space<vmem>>, %arg2: memref<256x32xbf16, #tpu.memory_space<vmem>>, %arg3: memref<1x32xf32, #tpu.memory_space<vmem>>, %arg4: memref<512x64xbf16, #tpu.memory_space<vmem>>, %arg5: memref<1x64xf32, #tpu.memory_space<vmem>>, %arg6: memref<576x64xbf16, #tpu.memory_space<vmem>>, %arg7: memref<1x64xf32, #tpu.memory_space<vmem>>, %arg8: memref<64x512xbf16, #tpu.memory_space<vmem>>, %arg9: memref<1x512xf32, #tpu.memory_space<vmem>>, %arg10: memref<512x128xbf16, #tpu.memory_space<vmem>>, %arg11: memref<1x128xf32, #tpu.memory_space<vmem>>, %arg12: memref<8x128xf32, #tpu.memory_space<vmem>>) attributes {dimension_semantics = [#tpu.dimension_semantics<parallel>], iteration_bounds = array<i64: 1>, scalar_prefetch = 0 : i64, scratch_operands = 0 : i64, tpu.core_type = #tpu.core_type<tc>, window_params = [{transform_indices = @transform_0, window_bounds = array<i64: 512, 256>}, {pipeline_mode = #tpu.pipeline_mode<synchronous>, transform_indices = @transform_1, window_bounds = array<i64: 256, 32>}, {pipeline_mode = #tpu.pipeline_mode<synchronous>, transform_indices = @transform_2, window_bounds = array<i64: 1, 32>}, {pipeline_mode = #tpu.pipeline_mode<synchronous>, transform_indices = @transform_3, window_bounds = array<i64: 512, 64>}, {pipeline_mode = #tpu.pipeline_mode<synchronous>, transform_indices = @transform_4, window_bounds = array<i64: 1, 64>}, {pipeline_mode = #tpu.pipeline_mode<synchronous>, transform_indices = @transform_5, window_bounds = array<i64: 576, 64>}, {pipeline_mode = #tpu.pipeline_mode<synchronous>, transform_indices = @transform_6, window_bounds = array<i64: 1, 64>}, {pipeline_mode = #tpu.pipeline_mode<synchronous>, transform_indices = @transform_7, window_bounds = array<i64: 64, 512>}, {pipeline_mode = #tpu.pipeline_mode<synchronous>, transform_indices = @transform_8, window_bounds = array<i64: 1, 512>}, {pipeline_mode = #tpu.pipeline_mode<synchronous>, transform_indices = @transform_9, window_bounds = array<i64: 512, 128>}, {pipeline_mode = #tpu.pipeline_mode<synchronous>, transform_indices = @transform_10, window_bounds = array<i64: 1, 128>}, {transform_indices = @transform_11, window_bounds = array<i64: 8, 128>}]} {
    %c0 = arith.constant 0 : index
    %c0_0 = arith.constant 0 : index
    %0 = vector.load %arg1[%c0, %c0_0] : memref<512x256xbf16, #tpu.memory_space<vmem>>, vector<512x256xbf16>
    %c0_1 = arith.constant 0 : index
    %c0_2 = arith.constant 0 : index
    %1 = vector.load %arg2[%c0_1, %c0_2] : memref<256x32xbf16, #tpu.memory_space<vmem>>, vector<256x32xbf16>
    %cst = arith.constant dense<0.000000e+00> : vector<512x32xf32>
    %2 = tpu.matmul %0, %1, %cst {dimension_numbers = #tpu.dot_dimension_numbers<[1], [0], [0], [1], [0, 0, 1, 1], [], []>} : vector<512x256xbf16>, vector<256x32xbf16>, vector<512x32xf32> -> vector<512x32xf32>
    %c0_3 = arith.constant 0 : index
    %c0_4 = arith.constant 0 : index
    %3 = vector.load %arg3[%c0_3, %c0_4] : memref<1x32xf32, #tpu.memory_space<vmem>>, vector<1x32xf32>
    %4 = vector.broadcast %3 : vector<1x32xf32> to vector<512x32xf32>
    %5 = arith.addf %2, %4 : vector<512x32xf32>
    %cst_5 = arith.constant 0.000000e+00 : f32
    %6 = vector.broadcast %cst_5 : f32 to vector<512x32xf32>
    %7 = arith.maximumf %5, %6 : vector<512x32xf32>
    %8 = arith.truncf %7 : vector<512x32xf32> to vector<512x32xbf16>
    %9 = vector.extract_strided_slice %8 {offsets = [0, 0], sizes = [128, 32], strides = [1, 1]} : vector<512x32xbf16> to vector<128x32xbf16>
    %10 = vector.extract_strided_slice %8 {offsets = [128, 0], sizes = [128, 32], strides = [1, 1]} : vector<512x32xbf16> to vector<128x32xbf16>
    %11 = vector.extract_strided_slice %8 {offsets = [256, 0], sizes = [128, 32], strides = [1, 1]} : vector<512x32xbf16> to vector<128x32xbf16>
    %12 = vector.extract_strided_slice %8 {offsets = [384, 0], sizes = [128, 32], strides = [1, 1]} : vector<512x32xbf16> to vector<128x32xbf16>
    %13 = tpu.concatenate %9, %10, %11, %12 in 1 : vector<128x32xbf16>, vector<128x32xbf16>, vector<128x32xbf16>, vector<128x32xbf16> -> vector<128x128xbf16>
    %14 = vector.extract_strided_slice %13 {offsets = [0, 0], sizes = [24, 128], strides = [1, 1]} : vector<128x128xbf16> to vector<24x128xbf16>
    %15 = vector.extract_strided_slice %13 {offsets = [32, 0], sizes = [24, 128], strides = [1, 1]} : vector<128x128xbf16> to vector<24x128xbf16>
    %16 = vector.extract_strided_slice %13 {offsets = [64, 0], sizes = [24, 128], strides = [1, 1]} : vector<128x128xbf16> to vector<24x128xbf16>
    %17 = tpu.concatenate %14, %15, %16 in 0 : vector<24x128xbf16>, vector<24x128xbf16>, vector<24x128xbf16> -> vector<72x128xbf16>
    %18 = vector.extract_strided_slice %13 {offsets = [8, 0], sizes = [24, 128], strides = [1, 1]} : vector<128x128xbf16> to vector<24x128xbf16>
    %19 = vector.extract_strided_slice %13 {offsets = [40, 0], sizes = [24, 128], strides = [1, 1]} : vector<128x128xbf16> to vector<24x128xbf16>
    %20 = vector.extract_strided_slice %13 {offsets = [72, 0], sizes = [24, 128], strides = [1, 1]} : vector<128x128xbf16> to vector<24x128xbf16>
    %21 = tpu.concatenate %18, %19, %20 in 0 : vector<24x128xbf16>, vector<24x128xbf16>, vector<24x128xbf16> -> vector<72x128xbf16>
    %22 = vector.extract_strided_slice %13 {offsets = [32, 0], sizes = [24, 128], strides = [1, 1]} : vector<128x128xbf16> to vector<24x128xbf16>
    %23 = vector.extract_strided_slice %13 {offsets = [64, 0], sizes = [24, 128], strides = [1, 1]} : vector<128x128xbf16> to vector<24x128xbf16>
    %24 = vector.extract_strided_slice %13 {offsets = [96, 0], sizes = [24, 128], strides = [1, 1]} : vector<128x128xbf16> to vector<24x128xbf16>
    %25 = tpu.concatenate %22, %23, %24 in 0 : vector<24x128xbf16>, vector<24x128xbf16>, vector<24x128xbf16> -> vector<72x128xbf16>
    %26 = vector.extract_strided_slice %13 {offsets = [40, 0], sizes = [24, 128], strides = [1, 1]} : vector<128x128xbf16> to vector<24x128xbf16>
    %27 = vector.extract_strided_slice %13 {offsets = [72, 0], sizes = [24, 128], strides = [1, 1]} : vector<128x128xbf16> to vector<24x128xbf16>
    %28 = vector.extract_strided_slice %13 {offsets = [104, 0], sizes = [24, 128], strides = [1, 1]} : vector<128x128xbf16> to vector<24x128xbf16>
    %29 = tpu.concatenate %26, %27, %28 in 0 : vector<24x128xbf16>, vector<24x128xbf16>, vector<24x128xbf16> -> vector<72x128xbf16>
    %30 = tpu.concatenate %17, %21, %25, %29 in 1 : vector<72x128xbf16>, vector<72x128xbf16>, vector<72x128xbf16>, vector<72x128xbf16> -> vector<72x512xbf16>
    %c0_6 = arith.constant 0 : index
    %c0_7 = arith.constant 0 : index
    %31 = vector.load %arg4[%c0_6, %c0_7] : memref<512x64xbf16, #tpu.memory_space<vmem>>, vector<512x64xbf16>
    %cst_8 = arith.constant dense<0.000000e+00> : vector<72x64xf32>
    %32 = tpu.matmul %30, %31, %cst_8 {dimension_numbers = #tpu.dot_dimension_numbers<[1], [0], [0], [1], [0, 0, 1, 1], [], []>} : vector<72x512xbf16>, vector<512x64xbf16>, vector<72x64xf32> -> vector<72x64xf32>
    %c0_9 = arith.constant 0 : index
    %c0_10 = arith.constant 0 : index
    %33 = vector.load %arg5[%c0_9, %c0_10] : memref<1x64xf32, #tpu.memory_space<vmem>>, vector<1x64xf32>
    %34 = vector.broadcast %33 : vector<1x64xf32> to vector<72x64xf32>
    %35 = arith.addf %32, %34 : vector<72x64xf32>
    %cst_11 = arith.constant 0.000000e+00 : f32
    %36 = vector.broadcast %cst_11 : f32 to vector<72x64xf32>
    %37 = arith.maximumf %35, %36 : vector<72x64xf32>
    %38 = arith.truncf %37 : vector<72x64xf32> to vector<72x64xbf16>
    %39 = vector.extract_strided_slice %38 {offsets = [0, 0], sizes = [8, 64], strides = [1, 1]} : vector<72x64xbf16> to vector<8x64xbf16>
    %40 = vector.extract_strided_slice %38 {offsets = [8, 0], sizes = [8, 64], strides = [1, 1]} : vector<72x64xbf16> to vector<8x64xbf16>
    %41 = vector.extract_strided_slice %38 {offsets = [16, 0], sizes = [8, 64], strides = [1, 1]} : vector<72x64xbf16> to vector<8x64xbf16>
    %42 = vector.extract_strided_slice %38 {offsets = [24, 0], sizes = [8, 64], strides = [1, 1]} : vector<72x64xbf16> to vector<8x64xbf16>
    %43 = vector.extract_strided_slice %38 {offsets = [32, 0], sizes = [8, 64], strides = [1, 1]} : vector<72x64xbf16> to vector<8x64xbf16>
    %44 = vector.extract_strided_slice %38 {offsets = [40, 0], sizes = [8, 64], strides = [1, 1]} : vector<72x64xbf16> to vector<8x64xbf16>
    %45 = vector.extract_strided_slice %38 {offsets = [48, 0], sizes = [8, 64], strides = [1, 1]} : vector<72x64xbf16> to vector<8x64xbf16>
    %46 = vector.extract_strided_slice %38 {offsets = [56, 0], sizes = [8, 64], strides = [1, 1]} : vector<72x64xbf16> to vector<8x64xbf16>
    %47 = vector.extract_strided_slice %38 {offsets = [64, 0], sizes = [8, 64], strides = [1, 1]} : vector<72x64xbf16> to vector<8x64xbf16>
    %48 = tpu.concatenate %39, %40, %41, %42, %43, %44, %45, %46, %47 in 1 : vector<8x64xbf16>, vector<8x64xbf16>, vector<8x64xbf16>, vector<8x64xbf16>, vector<8x64xbf16>, vector<8x64xbf16>, vector<8x64xbf16>, vector<8x64xbf16>, vector<8x64xbf16> -> vector<8x576xbf16>
    %c0_12 = arith.constant 0 : index
    %c0_13 = arith.constant 0 : index
    %49 = vector.load %arg6[%c0_12, %c0_13] : memref<576x64xbf16, #tpu.memory_space<vmem>>, vector<576x64xbf16>
    %cst_14 = arith.constant dense<0.000000e+00> : vector<8x64xf32>
    %50 = tpu.matmul %48, %49, %cst_14 {dimension_numbers = #tpu.dot_dimension_numbers<[1], [0], [0], [1], [0, 0, 1, 1], [], []>} : vector<8x576xbf16>, vector<576x64xbf16>, vector<8x64xf32> -> vector<8x64xf32>
    %c0_15 = arith.constant 0 : index
    %c0_16 = arith.constant 0 : index
    %51 = vector.load %arg7[%c0_15, %c0_16] : memref<1x64xf32, #tpu.memory_space<vmem>>, vector<1x64xf32>
    %52 = vector.broadcast %51 : vector<1x64xf32> to vector<8x64xf32>
    %53 = arith.addf %50, %52 : vector<8x64xf32>
    %cst_17 = arith.constant 0.000000e+00 : f32
    %54 = vector.broadcast %cst_17 : f32 to vector<8x64xf32>
    %55 = arith.maximumf %53, %54 : vector<8x64xf32>
    %56 = arith.truncf %55 : vector<8x64xf32> to vector<8x64xbf16>
    %c0_18 = arith.constant 0 : index
    %c0_19 = arith.constant 0 : index
    %57 = vector.load %arg8[%c0_18, %c0_19] : memref<64x512xbf16, #tpu.memory_space<vmem>>, vector<64x512xbf16>
    %cst_20 = arith.constant dense<0.000000e+00> : vector<8x512xf32>
    %58 = tpu.matmul %56, %57, %cst_20 {dimension_numbers = #tpu.dot_dimension_numbers<[1], [0], [0], [1], [0, 0, 1, 1], [], []>} : vector<8x64xbf16>, vector<64x512xbf16>, vector<8x512xf32> -> vector<8x512xf32>
    %c0_21 = arith.constant 0 : index
    %c0_22 = arith.constant 0 : index
    %59 = vector.load %arg9[%c0_21, %c0_22] : memref<1x512xf32, #tpu.memory_space<vmem>>, vector<1x512xf32>
    %60 = vector.broadcast %59 : vector<1x512xf32> to vector<8x512xf32>
    %61 = arith.addf %58, %60 : vector<8x512xf32>
    %cst_23 = arith.constant 0.000000e+00 : f32
    %62 = vector.broadcast %cst_23 : f32 to vector<8x512xf32>
    %63 = arith.maximumf %61, %62 : vector<8x512xf32>
    %64 = arith.truncf %63 : vector<8x512xf32> to vector<8x512xbf16>
    %c0_24 = arith.constant 0 : index
    %c0_25 = arith.constant 0 : index
    %65 = vector.load %arg10[%c0_24, %c0_25] : memref<512x128xbf16, #tpu.memory_space<vmem>>, vector<512x128xbf16>
    %cst_26 = arith.constant dense<0.000000e+00> : vector<8x128xf32>
    %66 = tpu.matmul %64, %65, %cst_26 {dimension_numbers = #tpu.dot_dimension_numbers<[1], [0], [0], [1], [0, 0, 1, 1], [], []>} : vector<8x512xbf16>, vector<512x128xbf16>, vector<8x128xf32> -> vector<8x128xf32>
    %c0_27 = arith.constant 0 : index
    %c0_28 = arith.constant 0 : index
    %67 = vector.load %arg11[%c0_27, %c0_28] : memref<1x128xf32, #tpu.memory_space<vmem>>, vector<1x128xf32>
    %68 = vector.broadcast %67 : vector<1x128xf32> to vector<8x128xf32>
    %69 = arith.addf %66, %68 : vector<8x128xf32>
    %c0_29 = arith.constant 0 : index
    %c0_30 = arith.constant 0 : index
    %70 = vector.load %arg12[%c0_29, %c0_30] : memref<8x128xf32, #tpu.memory_space<vmem>>, vector<8x128xf32>
    tpu.vector_store %arg12[%c0_29, %c0_30], %69 {strides = array<i32>} : memref<8x128xf32, #tpu.memory_space<vmem>>, vector<8x128xf32>,
    return
  }
  func.func @transform_0(%arg0: i32) -> (i32, i32) {
    %c0_i32 = arith.constant 0 : i32
    %c0_i32_0 = arith.constant 0 : i32
    return %arg0, %c0_i32 : i32, i32
  }
  func.func @transform_1(%arg0: i32) -> (i32, i32) {
    %c0_i32 = arith.constant 0 : i32
    %c0_i32_0 = arith.constant 0 : i32
    %c0_i32_1 = arith.constant 0 : i32
    return %c0_i32, %c0_i32_0 : i32, i32
  }
  func.func @transform_2(%arg0: i32) -> (i32, i32) {
    %c0_i32 = arith.constant 0 : i32
    %c0_i32_0 = arith.constant 0 : i32
    %c0_i32_1 = arith.constant 0 : i32
    return %c0_i32, %c0_i32_0 : i32, i32
  }
  func.func @transform_3(%arg0: i32) -> (i32, i32) {
    %c0_i32 = arith.constant 0 : i32
    %c0_i32_0 = arith.constant 0 : i32
    %c0_i32_1 = arith.constant 0 : i32
    return %c0_i32, %c0_i32_0 : i32, i32
  }
  func.func @transform_4(%arg0: i32) -> (i32, i32) {
    %c0_i32 = arith.constant 0 : i32
    %c0_i32_0 = arith.constant 0 : i32
    %c0_i32_1 = arith.constant 0 : i32
    return %c0_i32, %c0_i32_0 : i32, i32
  }
  func.func @transform_5(%arg0: i32) -> (i32, i32) {
    %c0_i32 = arith.constant 0 : i32
    %c0_i32_0 = arith.constant 0 : i32
    %c0_i32_1 = arith.constant 0 : i32
    return %c0_i32, %c0_i32_0 : i32, i32
  }
  func.func @transform_6(%arg0: i32) -> (i32, i32) {
    %c0_i32 = arith.constant 0 : i32
    %c0_i32_0 = arith.constant 0 : i32
    %c0_i32_1 = arith.constant 0 : i32
    return %c0_i32, %c0_i32_0 : i32, i32
  }
  func.func @transform_7(%arg0: i32) -> (i32, i32) {
    %c0_i32 = arith.constant 0 : i32
    %c0_i32_0 = arith.constant 0 : i32
    %c0_i32_1 = arith.constant 0 : i32
    return %c0_i32, %c0_i32_0 : i32, i32
  }
  func.func @transform_8(%arg0: i32) -> (i32, i32) {
    %c0_i32 = arith.constant 0 : i32
    %c0_i32_0 = arith.constant 0 : i32
    %c0_i32_1 = arith.constant 0 : i32
    return %c0_i32, %c0_i32_0 : i32, i32
  }
  func.func @transform_9(%arg0: i32) -> (i32, i32) {
    %c0_i32 = arith.constant 0 : i32
    %c0_i32_0 = arith.constant 0 : i32
    %c0_i32_1 = arith.constant 0 : i32
    return %c0_i32, %c0_i32_0 : i32, i32
  }
  func.func @transform_10(%arg0: i32) -> (i32, i32) {
    %c0_i32 = arith.constant 0 : i32
    %c0_i32_0 = arith.constant 0 : i32
    %c0_i32_1 = arith.constant 0 : i32
    return %c0_i32, %c0_i32_0 : i32, i32
  }
  func.func @transform_11(%arg0: i32) -> (i32, i32) {
    %c0_i32 = arith.constant 0 : i32
    %c0_i32_0 = arith.constant 0 : i32
    return %arg0, %c0_i32 : i32, i32
  }
}

</mosaic_0001>

<bundles_post_ra>
// kernel: _lambda_.1
= control target key start
LH: loop header
LB: loop body
LE: loop exit
PB: predicated region body
PF: predicated region fallthrough
CT: control target
= control target key end

     0   :  { %v3195_v0 = vmov 0   ;;  %s3197_s26 = smov 64   ;;  %s3198_s12 = smov 96   ;;  %vm1015_vm0 = vcmask 261120   ;;  %vm1040_vm1 = vcmask 523264   ;;  %vm1057_vm2 = vcmask 785408   ;;  %s4131_s1 = inlined_call_operand.vmem [shape: bf16[256,32], index: 1, kind: input, shape index: {}]   ;;  %s4132_s0 = inlined_call_operand.vmem [shape: bf16[512,256], index: 0, kind: input, shape index: {}]   ;;  %s4133_s2 = inlined_call_operand.vmem [shape: f32[1,32], index: 2, kind: input, shape index: {}]   ;;  %s4134_s3 = inlined_call_operand.vmem [shape: bf16[512,64], index: 3, kind: input, shape index: {}]   ;;  %s4135_s5 = inlined_call_operand.vmem [shape: bf16[576,64], index: 5, kind: input, shape index: {}]   ;;  %s4136_s4 = inlined_call_operand.vmem [shape: f32[1,64], index: 4, kind: input, shape index: {}]   ;;  %s4137_s7 = inlined_call_operand.vmem [shape: bf16[64,512], index: 7, kind: input, shape index: {}]   ;;  %s4138_s9 = inlined_call_operand.vmem [shape: bf16[512,128], index: 9, kind: input, shape index: {}]   ;;  %s4139_s6 = inlined_call_operand.vmem [shape: f32[1,64], index: 6, kind: input, shape index: {}]   ;;  %s4140_s8 = inlined_call_operand.vmem [shape: f32[1,512], index: 8, kind: input, shape index: {}]   ;;  %s4141_s10 = inlined_call_operand.vmem [shape: f32[1,128], index: 10, kind: input, shape index: {}]   ;;  %s4142_s11 = inlined_call_operand.vmem [shape: f32[8,128], index: 11, kind: output, shape index: {}]  }
   0x1   :  { %558 = vmatprep.subr.bf16.mxu0 %v3195_v0  ;;  %v2959_v1 = vld [vmem:[%s4131_s1 + $0x38] sm:$0xff]   ;;  %v2960_v2 = vld [vmem:[%s4131_s1 + $0x30] sm:$0xff]   ;;  %v2961_v3 = vld [vmem:[%s4131_s1 + $0x28] sm:$0xff]   ;;  %vm1083_vm3 = vcmask 1043456   ;;  %vm3200_vm4 = vmmov 0  }
   0x2   :  { %559 = vmatpush1.bf16.msra.mxu0 %v2959_v1  ;;  %v2962_v4 = vld [vmem:[%s4131_s1 + $0x20] sm:$0xff]   ;;  %v2963_v5 = vld [vmem:[%s4131_s1 + $0x18] sm:$0xff]   ;;  %v2964_v7 = vld [vmem:[%s4131_s1 + $0x10] sm:$0xff]  }
   0x3   :  { %560 = vmatprep.subr.bf16.mxu0 %v3195_v0  ;;  %v2977_v6 = vld [vmem:[%s4132_s0 + $0x4] ss:$8 sps:$4 sm:$0xff]   ;;  %v2967_v10 = vld [vmem:[%s4131_s1 + $0x78] sm:$0xff]   ;;  %v2968_v11 = vld [vmem:[%s4131_s1 + $0x70] sm:$0xff]  }
   0x4   :  { %590 = vmatprep.mubr.bf16.mxu0 %v2977_v6  ;;  %v2965_v8 = vld [vmem:[%s4131_s1 + $0x8] sm:$0xff]   ;;  %v2966_v9 = vld [vmem:[%s4131_s1] sm:$0xff]   ;;  %v2971_v14 = vld [vmem:[%s4131_s1 + $0x58] sm:$0xff]  }
   0x5   :  { %v2969_v12 = vld [vmem:[%s4131_s1 + $0x68] sm:$0xff]   ;;  %v2970_v13 = vld [vmem:[%s4131_s1 + $0x60] sm:$0xff]   ;;  %v2972_v15 = vld [vmem:[%s4131_s1 + $0x50] sm:$0xff]  }
   0x6   :  { %561 = vmatpush1.bf16.msra.mxu0 %v2960_v2  ;;  %v2973_v16 = vld [vmem:[%s4131_s1 + $0x48] sm:$0xff]   ;;  %v2974_v17 = vld [vmem:[%s4131_s1 + $0x40] sm:$0xff]   ;;  %v2978_v19 = vld [vmem:[%s4132_s0 + $0x14] ss:$8 sps:$4 sm:$0xff]  }
   0x7   :  { %562 = vmatprep.subr.bf16.mxu0 %v3195_v0  ;;  %v2975_v18 = vld [vmem:[%s4132_s0] ss:$8 sps:$4 sm:$0xff]   ;;  %v2980_v20 = vld [vmem:[%s4132_s0 + $0x10] ss:$8 sps:$4 sm:$0xff]   ;;  %v2981_v21 = vld [vmem:[%s4132_s0 + $0x24] ss:$8 sps:$4 sm:$0xff]  }
   0x8   :  { %v2983_v22 = vld [vmem:[%s4132_s0 + $0x20] ss:$8 sps:$4 sm:$0xff]   ;;  %v2984_v23 = vld [vmem:[%s4132_s0 + $0x34] ss:$8 sps:$4 sm:$0xff]   ;;  %v2986_v24 = vld [vmem:[%s4132_s0 + $0x30] ss:$8 sps:$4 sm:$0xff]  }
   0x9   :  { %v2987_v25 = vld [vmem:[%s4132_s0 + $0x44] ss:$8 sps:$4 sm:$0xff]   ;;  %v2989_v26 = vld [vmem:[%s4132_s0 + $0x40] ss:$8 sps:$4 sm:$0xff]   ;;  %v2990_v27 = vld [vmem:[%s4132_s0 + $0x54] ss:$8 sps:$4 sm:$0xff]  }
   0xa   :  { %563 = vmatpush1.bf16.msra.mxu0 %v2961_v3  ;;  %v2992_v28 = vld [vmem:[%s4132_s0 + $0x50] ss:$8 sps:$4 sm:$0xff]   ;;  %v2993_v29 = vld [vmem:[%s4132_s0 + $0x64] ss:$8 sps:$4 sm:$0xff]   ;;  %v2995_v30 = vld [vmem:[%s4132_s0 + $0x60] ss:$8 sps:$4 sm:$0xff]  }
   0xb   :  { %564 = vmatprep.subr.bf16.mxu0 %v3195_v0  ;;  %v2996_v31 = vld [vmem:[%s4132_s0 + $0x74] ss:$8 sps:$4 sm:$0xff]   ;;  %v2998_v32 = vld [vmem:[%s4132_s0 + $0x70] ss:$8 sps:$4 sm:$0xff]   ;;  %v2999_v33 = vld [vmem:[%s4132_s0 + $0x84] ss:$8 sps:$4 sm:$0xff]  }
   0xc   :  { %v3001_v34 = vld [vmem:[%s4132_s0 + $0x80] ss:$8 sps:$4 sm:$0xff]   ;;  %v3002_v35 = vld [vmem:[%s4132_s0 + $0x94] ss:$8 sps:$4 sm:$0xff]   ;;  %v3004_v36 = vld [vmem:[%s4132_s0 + $0x90] ss:$8 sps:$4 sm:$0xff]  }
   0xd   :  { %v3005_v37 = vld [vmem:[%s4132_s0 + $0xa4] ss:$8 sps:$4 sm:$0xff]   ;;  %v3007_v38 = vld [vmem:[%s4132_s0 + $0xa0] ss:$8 sps:$4 sm:$0xff]   ;;  %v3008_v39 = vld [vmem:[%s4132_s0 + $0xb4] ss:$8 sps:$4 sm:$0xff]  }
   0xe   :  { %565 = vmatpush1.bf16.msra.mxu0 %v2962_v4  ;;  %v3010_v40 = vld [vmem:[%s4132_s0 + $0xb0] ss:$8 sps:$4 sm:$0xff]   ;;  %v3011_v41 = vld [vmem:[%s4132_s0 + $0xc4] ss:$8 sps:$4 sm:$0xff]   ;;  %v3013_v42 = vld [vmem:[%s4132_s0 + $0xc0] ss:$8 sps:$4 sm:$0xff]  }
   0xf   :  { %566 = vmatprep.subr.bf16.mxu0 %v3195_v0  ;;  %v3014_v43 = vld [vmem:[%s4132_s0 + $0xd4] ss:$8 sps:$4 sm:$0xff]   ;;  %v3016_v44 = vld [vmem:[%s4132_s0 + $0xd0] ss:$8 sps:$4 sm:$0xff]   ;;  %v3017_v45 = vld [vmem:[%s4132_s0 + $0xe4] ss:$8 sps:$4 sm:$0xff]  }
  0x10   :  { %v3019_v46 = vld [vmem:[%s4132_s0 + $0xe0] ss:$8 sps:$4 sm:$0xff]   ;;  %v3020_v47 = vld [vmem:[%s4132_s0 + $0xf4] ss:$8 sps:$4 sm:$0xff]   ;;  %v3022_v48 = vld [vmem:[%s4132_s0 + $0xf0] ss:$8 sps:$4 sm:$0xff]  }
  0x11   :  { %v3023_v49 = vld [vmem:[%s4132_s0 + $0x104] ss:$8 sps:$4 sm:$0xff]   ;;  %v3025_v50 = vld [vmem:[%s4132_s0 + $0x100] ss:$8 sps:$4 sm:$0xff]   ;;  %v3026_v51 = vld [vmem:[%s4132_s0 + $0x114] ss:$8 sps:$4 sm:$0xff]  }
  0x12   :  { %567 = vmatpush1.bf16.msra.mxu0 %v2963_v5  ;;  %v3028_v52 = vld [vmem:[%s4132_s0 + $0x110] ss:$8 sps:$4 sm:$0xff]   ;;  %v3029_v53 = vld [vmem:[%s4132_s0 + $0x124] ss:$8 sps:$4 sm:$0xff]   ;;  %v3031_v54 = vld [vmem:[%s4132_s0 + $0x120] ss:$8 sps:$4 sm:$0xff]  }
  0x13   :  { %568 = vmatprep.subr.bf16.mxu0 %v3195_v0  ;;  %v3032_v55 = vld [vmem:[%s4132_s0 + $0x134] ss:$8 sps:$4 sm:$0xff]   ;;  %v3034_v56 = vld [vmem:[%s4132_s0 + $0x130] ss:$8 sps:$4 sm:$0xff]   ;;  %v3035_v57 = vld [vmem:[%s4132_s0 + $0x144] ss:$8 sps:$4 sm:$0xff]  }
  0x14   :  { %v3037_v58 = vld [vmem:[%s4132_s0 + $0x140] ss:$8 sps:$4 sm:$0xff]   ;;  %v3038_v59 = vld [vmem:[%s4132_s0 + $0x154] ss:$8 sps:$4 sm:$0xff]   ;;  %v3040_v60 = vld [vmem:[%s4132_s0 + $0x150] ss:$8 sps:$4 sm:$0xff]  }
  0x15   :  { %v3041_v61 = vld [vmem:[%s4132_s0 + $0x164] ss:$8 sps:$4 sm:$0xff]   ;;  %v3043_v62 = vld [vmem:[%s4132_s0 + $0x160] ss:$8 sps:$4 sm:$0xff]   ;;  %v3044_v63 = vld [vmem:[%s4132_s0 + $0x174] ss:$8 sps:$4 sm:$0xff]  }
  0x16   :  { %569 = vmatpush1.bf16.msra.mxu0 %v2964_v7  ;;  %v3046_v1 = vld [vmem:[%s4132_s0 + $0x170] ss:$8 sps:$4 sm:$0xff]   ;;  %v3047_v2 = vld [vmem:[%s4132_s0 + $0x184] ss:$8 sps:$4 sm:$0xff]   ;;  %v3049_v3 = vld [vmem:[%s4132_s0 + $0x180] ss:$8 sps:$4 sm:$0xff]  }
  0x17   :  { %570 = vmatprep.subr.bf16.mxu0 %v3195_v0  ;;  %v3050_v4 = vld [vmem:[%s4132_s0 + $0x194] ss:$8 sps:$4 sm:$0xff]   ;;  %v3481_v5 = vld [vmem:[%s4133_s2] ss:$0 sm:$0xff] }
  0x1a   :  { %571 = vmatpush1.bf16.msra.mxu0 %v2965_v8 }
  0x1b   :  { %572 = vmatprep.subr.bf16.mxu0 %v3195_v0 }
  0x1e   :  { %573 = vmatpush1.bf16.msra.mxu0 %v2966_v9 }
  0x1f   :  { %574 = vmatprep.subr.bf16.mxu0 %v3195_v0 }
  0x22   :  { %575 = vmatpush2.bf16.msra.mxu0 %v2967_v10  ;;  %v3052_v10 = vld [vmem:[%s4132_s0 + $0x190] ss:$8 sps:$4 sm:$0xff]  }
  0x23   :  { %576 = vmatprep.subr.bf16.mxu0 %v3195_v0 }
  0x26   :  { %577 = vmatpush2.bf16.msra.mxu0 %v2968_v11 }
  0x27   :  { %578 = vmatprep.subr.bf16.mxu0 %v3195_v0 }
  0x2a   :  { %579 = vmatpush2.bf16.msra.mxu0 %v2969_v12  ;;  %v3053_v12 = vld [vmem:[%s4132_s0 + $0x1a4] ss:$8 sps:$4 sm:$0xff]  }
  0x2b   :  { %580 = vmatprep.subr.bf16.mxu0 %v3195_v0 }
  0x2e   :  { %581 = vmatpush2.bf16.msra.mxu0 %v2970_v13 }
  0x2f   :  { %582 = vmatprep.subr.bf16.mxu0 %v3195_v0 }
  0x32   :  { %583 = vmatpush2.bf16.msra.mxu0 %v2971_v14 }
  0x33   :  { %584 = vmatprep.subr.bf16.mxu0 %v3195_v0 }
  0x36   :  { %585 = vmatpush2.bf16.msra.mxu0 %v2972_v15 }
  0x37   :  { %586 = vmatprep.subr.bf16.mxu0 %v3195_v0 }
  0x3a   :  { %587 = vmatpush2.bf16.msra.mxu0 %v2973_v16 }
  0x3b   :  { %588 = vmatprep.subr.bf16.mxu0 %v3195_v0 }
  0x3e   :  { %589 = vmatpush2.bf16.msra.mxu0 %v2974_v17 }
  0x41   :  { %591 = vmatmul.mubr.bf16.vlgmr.msra.gmra.mxu0 %v2975_v18 }
  0x42   :  { %598 = vmatprep.mubr.bf16.mxu0 %v2978_v19 }
  0x49   :  { %599 = vmatmul.mubr.bf16.gmra.mxu0 %v2980_v20 }
  0x4a   :  { %606 = vmatprep.mubr.bf16.mxu0 %v2981_v21  ;;  %v3055_v21 = vld [vmem:[%s4132_s0 + $0x1a0] ss:$8 sps:$4 sm:$0xff]  }
  0x51   :  { %607 = vmatmul.mubr.bf16.gmra.mxu0 %v2983_v22 }
  0x52   :  { %614 = vmatprep.mubr.bf16.mxu0 %v2984_v23  ;;  %v3056_v23 = vld [vmem:[%s4132_s0 + $0x1b4] ss:$8 sps:$4 sm:$0xff]  }
  0x59   :  { %615 = vmatmul.mubr.bf16.gmra.mxu0 %v2986_v24 }
  0x5a   :  { %622 = vmatprep.mubr.bf16.mxu0 %v2987_v25 }
  0x61   :  { %623 = vmatmul.mubr.bf16.gmra.mxu0 %v2989_v26 }
  0x62   :  { %630 = vmatprep.mubr.bf16.mxu0 %v2990_v27 }
  0x69   :  { %631 = vmatmul.mubr.bf16.gmra.mxu0 %v2992_v28 }
  0x6a   :  { %638 = vmatprep.mubr.bf16.mxu0 %v2993_v29 }
  0x71   :  { %639 = vmatmul.mubr.bf16.gmra.mxu0 %v2995_v30 }
  0x72   :  { %646 = vmatprep.mubr.bf16.mxu0 %v2996_v31 }
  0x79   :  { %647 = vmatmul.mubr.bf16.gmra.mxu0 %v2998_v32  ;;  %v3058_v32 = vld [vmem:[%s4132_s0 + $0x1b0] ss:$8 sps:$4 sm:$0xff]  }
  0x7a   :  { %654 = vmatprep.mubr.bf16.mxu0 %v2999_v33 }
  0x81   :  { %655 = vmatmul.mubr.bf16.gmra.mxu0 %v3001_v34  ;;  %v3061_v34 = vld [vmem:[%s4132_s0 + $0x1c4] ss:$8 sps:$4 sm:$0xff]  }
  0x82   :  { %662 = vmatprep.mubr.bf16.mxu0 %v3002_v35 }
  0x89   :  { %663 = vmatmul.mubr.bf16.gmra.mxu0 %v3004_v36 }
  0x8a   :  { %670 = vmatprep.mubr.bf16.mxu0 %v3005_v37 }
  0x91   :  { %671 = vmatmul.mubr.bf16.gmra.mxu0 %v3007_v38 }
  0x92   :  { %678 = vmatprep.mubr.bf16.mxu0 %v3008_v39 }
  0x99   :  { %679 = vmatmul.mubr.bf16.gmra.mxu0 %v3010_v40 }
  0x9a   :  { %686 = vmatprep.mubr.bf16.mxu0 %v3011_v41 }
  0xa1   :  { %687 = vmatmul.mubr.bf16.gmra.mxu0 %v3013_v42 }
  0xa2   :  { %694 = vmatprep.mubr.bf16.mxu0 %v3014_v43  ;;  %v3059_v43 = vld [vmem:[%s4132_s0 + $0x1c0] ss:$8 sps:$4 sm:$0xff]  }
  0xa9   :  { %695 = vmatmul.mubr.bf16.gmra.mxu0 %v3016_v44 }
  0xaa   :  { %702 = vmatprep.mubr.bf16.mxu0 %v3017_v45  ;;  %v3064_v45 = vld [vmem:[%s4132_s0 + $0x1d4] ss:$8 sps:$4 sm:$0xff]  }
  0xb1   :  { %703 = vmatmul.mubr.bf16.gmra.mxu0 %v3019_v46 }
  0xb2   :  { %710 = vmatprep.mubr.bf16.mxu0 %v3020_v47 }
  0xb9   :  { %711 = vmatmul.mubr.bf16.gmra.mxu0 %v3022_v48 }
  0xba   :  { %718 = vmatprep.mubr.bf16.mxu0 %v3023_v49 }
  0xc1   :  { %719 = vmatmul.mubr.bf16.gmra.mxu0 %v3025_v50 }
  0xc2   :  { %726 = vmatprep.mubr.bf16.mxu0 %v3026_v51 }
  0xc9   :  { %727 = vmatmul.mubr.bf16.gmra.mxu0 %v3028_v52 }
  0xca   :  { %734 = vmatprep.mubr.bf16.mxu0 %v3029_v53 }
  0xd1   :  { %735 = vmatmul.mubr.bf16.gmra.mxu0 %v3031_v54  ;;  %v3062_v54 = vld [vmem:[%s4132_s0 + $0x1d0] ss:$8 sps:$4 sm:$0xff]  }
  0xd2   :  { %742 = vmatprep.mubr.bf16.mxu0 %v3032_v55 }
  0xd9   :  { %743 = vmatmul.mubr.bf16.gmra.mxu0 %v3034_v56  ;;  %v3067_v56 = vld [vmem:[%s4132_s0 + $0x1e4] ss:$8 sps:$4 sm:$0xff]  }
  0xda   :  { %750 = vmatprep.mubr.bf16.mxu0 %v3035_v57 }
  0xe1   :  { %751 = vmatmul.mubr.bf16.gmra.mxu0 %v3037_v58 }
  0xe2   :  { %758 = vmatprep.mubr.bf16.mxu0 %v3038_v59 }
  0xe9   :  { %759 = vmatmul.mubr.bf16.gmra.mxu0 %v3040_v60 }
  0xea   :  { %766 = vmatprep.mubr.bf16.mxu0 %v3041_v61 }
  0xf1   :  { %767 = vmatmul.mubr.bf16.gmra.mxu0 %v3043_v62 }
  0xf2   :  { %774 = vmatprep.mubr.bf16.mxu0 %v3044_v63 }
  0xf9   :  { %775 = vmatmul.mubr.bf16.gmra.mxu0 %v3046_v1 }
  0xfa   :  { %782 = vmatprep.mubr.bf16.mxu0 %v3047_v2  ;;  %v3065_v2 = vld [vmem:[%s4132_s0 + $0x1e0] ss:$8 sps:$4 sm:$0xff]  }
 0x101   :  { %v592_v6 = vpop.f32.mrf.mxu0  ;;  %783 = vmatmul.mubr.bf16.gmra.mxu0 %v3049_v3 }
 0x102   :  { %790 = vmatprep.mubr.bf16.mxu0 %v3050_v4  ;;  %v593_v8 = vadd.f32 %v3481_v5, %v592_v6  ;;  %v3070_v4 = vld [vmem:[%s4132_s0 + $0x1f4] ss:$8 sps:$4 sm:$0xff]  }
 0x103   :  { %v594_v7 = vpop.f32.mrf.mxu0 }
 0x104   :  { %v847_v14 = vmax.f32 %v593_v8, 0.0 }
 0x105   :  { %v595_v9 = vpop.f32.mrf.mxu0 }
 0x106   :  { %v596_v11 = vadd.f32 %v3481_v5, %v595_v9 }
 0x107   :  { %v597_v13 = vpop.f32.mrf.mxu0 }
 0x108   :  { %v848_v15 = vmax.f32 %v596_v11, 0.0 }
 0x109   :  { %v600_v16 = vpop.f32.mrf.mxu0  ;;  %791 = vmatmul.mubr.bf16.gmra.mxu0 %v3052_v10 }
 0x10a   :  { %v3491_v17 = vpack.c.bf16 %v848_v15, %v847_v14  ;;  %798 = vmatprep.mubr.bf16.mxu0 %v3053_v12  ;;  %v601_v19 = vadd.f32 %v3481_v5, %v600_v16  ;;  %v3068_v14 = vld [vmem:[%s4132_s0 + $0x1f0] ss:$8 sps:$4 sm:$0xff]   ;;  %s3196_s0 = smov 32  }
 0x10b   :  { %v602_v18 = vpop.f32.mrf.mxu0 }
 0x10c   :  { %v849_v25 = vmax.f32 %v601_v19, 0.0 }
 0x10d   :  { %v603_v20 = vpop.f32.mrf.mxu0 }
 0x10e   :  { %v604_v22 = vadd.f32 %v3481_v5, %v603_v20 }
 0x10f   :  { %v605_v24 = vpop.f32.mrf.mxu0 }
 0x110   :  { %v850_v26 = vmax.f32 %v604_v22, 0.0 }
 0x111   :  { %v608_v27 = vpop.f32.mrf.mxu0  ;;  %799 = vmatmul.mubr.bf16.gmra.mxu0 %v3055_v21 }
 0x112   :  { %v3501_v28 = vpack.c.bf16 %v850_v26, %v849_v25  ;;  %806 = vmatprep.mubr.bf16.mxu0 %v3056_v23  ;;  %v609_v30 = vadd.f32 %v3481_v5, %v608_v27 }
 0x113   :  { %v610_v29 = vpop.f32.mrf.mxu0 }
 0x114   :  { %v851_v36 = vmax.f32 %v609_v30, 0.0 }
 0x115   :  { %v611_v31 = vpop.f32.mrf.mxu0 }
 0x116   :  { %v612_v33 = vadd.f32 %v3481_v5, %v611_v31 }
 0x117   :  { %v613_v35 = vpop.f32.mrf.mxu0 }
 0x118   :  { %v852_v37 = vmax.f32 %v612_v33, 0.0 }
 0x119   :  { %v616_v38 = vpop.f32.mrf.mxu0  ;;  %807 = vmatmul.mubr.bf16.gmra.mxu0 %v3058_v32 }
 0x11a   :  { %v3511_v39 = vpack.c.bf16 %v852_v37, %v851_v36  ;;  %814 = vmatprep.mubr.bf16.mxu0 %v3061_v34  ;;  %v617_v41 = vadd.f32 %v3481_v5, %v616_v38 }
 0x11b   :  { %v618_v40 = vpop.f32.mrf.mxu0 }
 0x11c   :  { %v853_v47 = vmax.f32 %v617_v41, 0.0 }
 0x11d   :  { %v619_v42 = vpop.f32.mrf.mxu0 }
 0x11e   :  { %v620_v44 = vadd.f32 %v3481_v5, %v619_v42 }
 0x11f   :  { %v621_v46 = vpop.f32.mrf.mxu0 }
 0x120   :  { %v854_v48 = vmax.f32 %v620_v44, 0.0 }
 0x121   :  { %v624_v49 = vpop.f32.mrf.mxu0  ;;  %815 = vmatmul.mubr.bf16.gmra.mxu0 %v3059_v43 }
 0x122   :  { %v3521_v50 = vpack.c.bf16 %v854_v48, %v853_v47  ;;  %822 = vmatprep.mubr.bf16.mxu0 %v3064_v45  ;;  %v625_v52 = vadd.f32 %v3481_v5, %v624_v49 }
 0x123   :  { %v626_v51 = vpop.f32.mrf.mxu0 }
 0x124   :  { %v855_v58 = vmax.f32 %v625_v52, 0.0 }
 0x125   :  { %v627_v53 = vpop.f32.mrf.mxu0 }
 0x126   :  { %v628_v55 = vadd.f32 %v3481_v5, %v627_v53 }
 0x127   :  { %v629_v57 = vpop.f32.mrf.mxu0 }
 0x128   :  { %v856_v59 = vmax.f32 %v628_v55, 0.0 }
 0x129   :  { %v632_v60 = vpop.f32.mrf.mxu0  ;;  %823 = vmatmul.mubr.bf16.gmra.mxu0 %v3062_v54 }
 0x12a   :  { %v3531_v61 = vpack.c.bf16 %v856_v59, %v855_v58  ;;  %830 = vmatprep.mubr.bf16.mxu0 %v3067_v56  ;;  %v633_v63 = vadd.f32 %v3481_v5, %v632_v60 }
 0x12b   :  { %v634_v62 = vpop.f32.mrf.mxu0 }
 0x12c   :  { %v857_v7 = vmax.f32 %v633_v63, 0.0 }
 0x12d   :  { %v635_v1 = vpop.f32.mrf.mxu0 }
 0x12e   :  { %v636_v3 = vadd.f32 %v3481_v5, %v635_v1 }
 0x12f   :  { %v637_v6 = vpop.f32.mrf.mxu0 }
 0x130   :  { %v858_v8 = vmax.f32 %v636_v3, 0.0 }
 0x131   :  { %v640_v9 = vpop.f32.mrf.mxu0  ;;  %831 = vmatmul.mubr.bf16.gmra.mxu0 %v3065_v2 }
 0x132   :  { %v3541_v10 = vpack.c.bf16 %v858_v8, %v857_v7  ;;  %838 = vmatprep.mubr.bf16.mxu0 %v3070_v4  ;;  %v641_v12 = vadd.f32 %v3481_v5, %v640_v9 }
 0x133   :  { %v642_v11 = vpop.f32.mrf.mxu0 }
 0x134   :  { %v859_v18 = vmax.f32 %v641_v12, 0.0 }
 0x135   :  { %v643_v13 = vpop.f32.mrf.mxu0 }
 0x136   :  { %v644_v15 = vadd.f32 %v3481_v5, %v643_v13 }
 0x137   :  { %v645_v16 = vpop.f32.mrf.mxu0 }
 0x138   :  { %v860_v19 = vmax.f32 %v644_v15, 0.0 }
 0x139   :  { %v648_v20 = vpop.f32.mrf.mxu0  ;;  %839 = vmatmul.mubr.bf16.gmra.mxu0 %v3068_v14 }
 0x13a   :  { %v3548_v21 = vpack.c.bf16 %v860_v19, %v859_v18  ;;  %v649_v23 = vadd.f32 %v3481_v5, %v648_v20 }
 0x13b   :  { %v650_v22 = vpop.f32.mrf.mxu0 }
 0x13c   :  { %v861_v27 = vmax.f32 %v649_v23, 0.0 }
 0x13d   :  { %v651_v24 = vpop.f32.mrf.mxu0 }
 0x13e   :  { %v652_v25 = vadd.f32 %v3481_v5, %v651_v24 }
 0x13f   :  { %v653_v26 = vpop.f32.mrf.mxu0 }
 0x140   :  { %v862_v29 = vmax.f32 %v652_v25, 0.0 }
 0x141   :  { %v656_v30 = vpop.f32.mrf.mxu0 }
 0x142   :  { %v3552_v31 = vpack.c.bf16 %v862_v29, %v861_v27  ;;  %v657_v33 = vadd.f32 %v3481_v5, %v656_v30 }
 0x143   :  { %v658_v32 = vpop.f32.mrf.mxu0 }
 0x144   :  { %v863_v37 = vmax.f32 %v657_v33, 0.0 }
 0x145   :  { %v659_v34 = vpop.f32.mrf.mxu0 }
 0x146   :  { %v660_v35 = vadd.f32 %v3481_v5, %v659_v34 }
 0x147   :  { %v661_v36 = vpop.f32.mrf.mxu0 }
 0x148   :  { %v864_v38 = vmax.f32 %v660_v35, 0.0 }
 0x149   :  { %v664_v40 = vpop.f32.mrf.mxu0 }
 0x14a   :  { %v919_v41 = vpack.c.bf16 %v864_v38, %v863_v37  ;;  %v665_v43 = vadd.f32 %v3481_v5, %v664_v40 }
 0x14b   :  { %v666_v42 = vpop.f32.mrf.mxu0 }
 0x14c   :  { %951 = vrot.lane.b32.xlu0 %v919_v41, %s3196_s0  ;;  %v865_v47 = vmax.f32 %v665_v43, 0.0 }
 0x14d   :  { %v667_v44 = vpop.f32.mrf.mxu0 }
 0x14e   :  { %v668_v45 = vadd.f32 %v3481_v5, %v667_v44 }
 0x14f   :  { %v669_v46 = vpop.f32.mrf.mxu0 }
 0x150   :  { %v866_v48 = vmax.f32 %v668_v45, 0.0 }
 0x151   :  { %v672_v49 = vpop.f32.mrf.mxu0 }
 0x152   :  { %v920_v51 = vpack.c.bf16 %v866_v48, %v865_v47  ;;  %v673_v53 = vadd.f32 %v3481_v5, %v672_v49 }
 0x153   :  { %v674_v52 = vpop.f32.mrf.mxu0 }
 0x154   :  { %953 = vrot.lane.b32.xlu0 %v920_v51, %s3196_s0  ;;  %v867_v57 = vmax.f32 %v673_v53, 0.0 }
 0x155   :  { %v675_v54 = vpop.f32.mrf.mxu0 }
 0x156   :  { %v676_v55 = vadd.f32 %v3481_v5, %v675_v54 }
 0x157   :  { %v677_v56 = vpop.f32.mrf.mxu0 }
 0x158   :  { %v868_v58 = vmax.f32 %v676_v55, 0.0 }
 0x159   :  { %v680_v59 = vpop.f32.mrf.mxu0 }
 0x15a   :  { %v3562_v60 = vpack.c.bf16 %v868_v58, %v867_v57  ;;  %v681_v63 = vadd.f32 %v3481_v5, %v680_v59  ;;  %v3071_v59 = vld [vmem:[%s4134_s3 + $0x78] sm:$0xff]  }
 0x15b   :  { %v682_v62 = vpop.f32.mrf.mxu0  ;;  %2756 = vmatprep.subr.bf16.mxu1 %v3071_v59 }
 0x15c   :  { %v869_v4 = vmax.f32 %v681_v63, 0.0  ;;  %v3072_v63 = vld [vmem:[%s4134_s3 + $0x38] sm:$0xff]  }
 0x15d   :  { %v683_v1 = vpop.f32.mrf.mxu0  ;;  %2757 = vmatpush3.bf16.msra.mxu1 %v3072_v63 }
 0x15e   :  { %v684_v2 = vadd.f32 %v3481_v5, %v683_v1 }
 0x15f   :  { %v685_v3 = vpop.f32.mrf.mxu0 }
 0x160   :  { %v870_v6 = vmax.f32 %v684_v2, 0.0  ;;  %v3073_v2 = vld [vmem:[%s4134_s3 + $0x70] sm:$0xff]  }
 0x161   :  { %v688_v7 = vpop.f32.mrf.mxu0  ;;  %2758 = vmatprep.subr.bf16.mxu1 %v3073_v2 }
 0x162   :  { %v3566_v8 = vpack.c.bf16 %v870_v6, %v869_v4  ;;  %v689_v11 = vadd.f32 %v3481_v5, %v688_v7  ;;  %v3074_v6 = vld [vmem:[%s4134_s3 + $0x30] sm:$0xff]   ;;  %v3075_v7 = vld [vmem:[%s4134_s3 + $0x68] sm:$0xff]  }
 0x163   :  { %v690_v9 = vpop.f32.mrf.mxu0  ;;  %2759 = vmatpush3.bf16.msra.mxu1 %v3074_v6  ;;  %v3086_v6 = vld [vmem:[%s4134_s3] sm:$0xff]  }
 0x164   :  { %v871_v15 = vmax.f32 %v689_v11, 0.0  ;;  %2760 = vmatprep.subr.bf16.mxu1 %v3075_v7 }
 0x165   :  { %v691_v12 = vpop.f32.mrf.mxu0 }
 0x166   :  { %v692_v13 = vadd.f32 %v3481_v5, %v691_v12 }
 0x167   :  { %v693_v14 = vpop.f32.mrf.mxu0 }
 0x168   :  { %v872_v16 = vmax.f32 %v692_v13, 0.0  ;;  %v3076_v14 = vld [vmem:[%s4134_s3 + $0x28] sm:$0xff]  }
 0x169   :  { %v696_v18 = vpop.f32.mrf.mxu0  ;;  %2761 = vmatpush3.bf16.msra.mxu1 %v3076_v14 }
 0x16a   :  { %v3570_v19 = vpack.c.bf16 %v872_v16, %v871_v15  ;;  %v697_v22 = vadd.f32 %v3481_v5, %v696_v18  ;;  %v3077_v16 = vld [vmem:[%s4134_s3 + $0x60] sm:$0xff]  }
 0x16b   :  { %v698_v20 = vpop.f32.mrf.mxu0  ;;  %2762 = vmatprep.subr.bf16.mxu1 %v3077_v16 }
 0x16c   :  { %v873_v26 = vmax.f32 %v697_v22, 0.0  ;;  %v3078_v20 = vld [vmem:[%s4134_s3 + $0x20] sm:$0xff]  }
 0x16d   :  { %v699_v23 = vpop.f32.mrf.mxu0  ;;  %2763 = vmatpush3.bf16.msra.mxu1 %v3078_v20 }
 0x16e   :  { %v700_v24 = vadd.f32 %v3481_v5, %v699_v23 }
 0x16f   :  { %v701_v25 = vpop.f32.mrf.mxu0 }
 0x170   :  { %v874_v27 = vmax.f32 %v700_v24, 0.0  ;;  %v3079_v24 = vld [vmem:[%s4134_s3 + $0x58] sm:$0xff]  }
 0x171   :  { %v704_v29 = vpop.f32.mrf.mxu0  ;;  %2764 = vmatprep.subr.bf16.mxu1 %v3079_v24 }
 0x172   :  { %v3574_v30 = vpack.c.bf16 %v874_v27, %v873_v26  ;;  %v705_v33 = vadd.f32 %v3481_v5, %v704_v29  ;;  %v3080_v26 = vld [vmem:[%s4134_s3 + $0x18] sm:$0xff]  }
 0x173   :  { %v706_v32 = vpop.f32.mrf.mxu0  ;;  %2765 = vmatpush3.bf16.msra.mxu1 %v3080_v26 }
 0x174   :  { %v875_v37 = vmax.f32 %v705_v33, 0.0 }
 0x175   :  { %v707_v34 = vpop.f32.mrf.mxu0 }
 0x176   :  { %v708_v35 = vadd.f32 %v3481_v5, %v707_v34 }
 0x177   :  { %v709_v36 = vpop.f32.mrf.mxu0 }
 0x178   :  { %v876_v38 = vmax.f32 %v708_v35, 0.0 }
 0x179   :  { %v712_v40 = vpop.f32.mrf.mxu0 }
 0x17a   :  { %v3578_v41 = vpack.c.bf16 %v876_v38, %v875_v37  ;;  %v713_v43 = vadd.f32 %v3481_v5, %v712_v40 }
 0x17b   :  { %v714_v42 = vpop.f32.mrf.mxu0 }
 0x17c   :  { %v877_v47 = vmax.f32 %v713_v43, 0.0 }
 0x17d   :  { %v715_v44 = vpop.f32.mrf.mxu0 }
 0x17e   :  { %v716_v45 = vadd.f32 %v3481_v5, %v715_v44 }
 0x17f   :  { %v717_v46 = vpop.f32.mrf.mxu0 }
 0x180   :  { %v878_v48 = vmax.f32 %v716_v45, 0.0 }
 0x181   :  { %v720_v49 = vpop.f32.mrf.mxu0 }
 0x182   :  { %v3582_v51 = vpack.c.bf16 %v878_v48, %v877_v47  ;;  %v721_v52 = vadd.f32 %v3481_v5, %v720_v49 }
 0x183   :  { %v722_v53 = vpop.f32.mrf.mxu0 }
 0x184   :  { %v879_v56 = vmax.f32 %v721_v52, 0.0 }
 0x185   :  { %v723_v54 = vpop.f32.mrf.mxu0 }
 0x186   :  { %v724_v55 = vadd.f32 %v3481_v5, %v723_v54  ;;  %v3081_v54 = vld [vmem:[%s4134_s3 + $0x50] sm:$0xff]  }
 0x187   :  { %v725_v57 = vpop.f32.mrf.mxu0  ;;  %2766 = vmatprep.subr.bf16.mxu1 %v3081_v54 }
 0x188   :  { %v880_v58 = vmax.f32 %v724_v55, 0.0 }
 0x189   :  { %v728_v62 = vpop.f32.mrf.mxu0 }
 0x18a   :  { %v927_v1 = vpack.c.bf16 %v880_v58, %v879_v56  ;;  %v729_v3 = vadd.f32 %v3481_v5, %v728_v62  ;;  %v3082_v56 = vld [vmem:[%s4134_s3 + $0x10] sm:$0xff]   ;;  %v3083_v58 = vld [vmem:[%s4134_s3 + $0x48] sm:$0xff]  }
 0x18b   :  { %v730_v4 = vpop.f32.mrf.mxu0  ;;  %2767 = vmatpush3.bf16.msra.mxu1 %v3082_v56  ;;  %v3084_v62 = vld [vmem:[%s4134_s3 + $0x8] sm:$0xff]  }
 0x18c   :  { %975 = vrot.lane.b32.xlu1 %v927_v1, %s3197_s26  ;;  %v881_v12 = vmax.f32 %v729_v3, 0.0  ;;  %2768 = vmatprep.subr.bf16.mxu1 %v3083_v58  ;;  %v3085_v3 = vld [vmem:[%s4134_s3 + $0x40] sm:$0xff]  }
 0x18d   :  { %v731_v9 = vpop.f32.mrf.mxu0 }
 0x18e   :  { %v732_v11 = vadd.f32 %v3481_v5, %v731_v9 }
 0x18f   :  { %v733_v13 = vpop.f32.mrf.mxu0  ;;  %2769 = vmatpush3.bf16.msra.mxu1 %v3084_v62 }
 0x190   :  { %v882_v15 = vmax.f32 %v732_v11, 0.0  ;;  %2770 = vmatprep.subr.bf16.mxu1 %v3085_v3 }
 0x191   :  { %v3610_v18 = vpop.f32.mrf.mxu0 }
 0x192   :  { %v928_v22 = vpack.c.bf16 %v882_v15, %v881_v12 }
 0x193   :  { %v738_v23 = vpop.f32.mrf.mxu0  ;;  %2771 = vmatpush3.bf16.msra.mxu1 %v3086_v6 }
 0x194   :  { %977 = vrot.lane.b32.xlu1 %v928_v22, %s3197_s26  ;;  %v737_v23 = vadd.f32 %v3481_v5, %v3610_v18 }
 0x195   :  { %v739_v25 = vpop.f32.mrf.mxu0 }
 0x196   :  { %v740_v16 = vadd.f32 %v3481_v5, %v739_v25  ;;  %v883_v25 = vmax.f32 %v737_v23, 0.0 }
 0x197   :  { %v741_v27 = vpop.f32.mrf.mxu0 }
 0x199   :  { %v3622_v29 = vpop.f32.mrf.mxu0 }
 0x19b   :  { %v746_v32 = vpop.f32.mrf.mxu0 }
 0x19c   :  { %v884_v32 = vmax.f32 %v740_v16, 0.0 }
 0x19d   :  { %v3624_v33 = vpop.f32.mrf.mxu0 }
 0x19e   :  { %v929_v18 = vpack.c.bf16 %v884_v32, %v883_v25 }
 0x19f   :  { %v749_v34 = vpop.f32.mrf.mxu0 }
 0x1a1   :  { %v3626_v35 = vpop.f32.mrf.mxu0 }
 0x1a2   :  { %v753_v6 = vadd.f32 %v3481_v5, %v3626_v35 }
 0x1a3   :  { %v754_v36 = vpop.f32.mrf.mxu0 }
 0x1a5   :  { %v3628_v37 = vpop.f32.mrf.mxu0 }
 0x1a7   :  { %v757_v38 = vpop.f32.mrf.mxu0 }
 0x1a8   :  { %v3087_v38 = vld [vmem:[%s4134_s3 + $0xf8] sm:$0xff]  }
 0x1a9   :  { %v3630_v40 = vpop.f32.mrf.mxu0  ;;  %2802 = vmatprep.subr.bf16.mxu1 %v3087_v38 }
 0x1ab   :  { %v762_v42 = vpop.f32.mrf.mxu0 }
 0x1ad   :  { %v3632_v43 = vpop.f32.mrf.mxu0 }
 0x1af   :  { %v765_v44 = vpop.f32.mrf.mxu0 }
 0x1b1   :  { %v3634_v45 = vpop.f32.mrf.mxu0 }
 0x1b3   :  { %v770_v46 = vpop.f32.mrf.mxu0 }
 0x1b4   :  { %v748_v46 = vadd.f32 %v3481_v5, %v3624_v33 }
 0x1b5   :  { %v3636_v47 = vpop.f32.mrf.mxu0 }
 0x1b7   :  { %v773_v48 = vpop.f32.mrf.mxu0 }
 0x1b9   :  { %v3638_v49 = vpop.f32.mrf.mxu0 }
 0x1bb   :  { %v778_v52 = vpop.f32.mrf.mxu0 }
 0x1bc   :  { %v745_v52 = vadd.f32 %v3481_v5, %v3622_v29  ;;  %v756_v29 = vadd.f32 %v3481_v5, %v3628_v37 }
 0x1bd   :  { %v3640_v53 = vpop.f32.mrf.mxu0 }
 0x1be   :  { %v885_v62 = vmax.f32 %v745_v52, 0.0 }
 0x1bf   :  { %v781_v55 = vpop.f32.mrf.mxu0 }
 0x1c1   :  { %v784_v57 = vpop.f32.mrf.mxu0 }
 0x1c2   :  { %v785_v63 = vadd.f32 %v3481_v5, %v784_v57  ;;  %v886_v57 = vmax.f32 %v748_v46, 0.0 }
 0x1c3   :  { %v786_v59 = vpop.f32.mrf.mxu0 }
 0x1c4   :  { %v895_v7 = vmax.f32 %v785_v63, 0.0 }
 0x1c5   :  { %v787_v1 = vpop.f32.mrf.mxu0 }
 0x1c6   :  { %v788_v2 = vadd.f32 %v3481_v5, %v787_v1  ;;  %v930_v1 = vpack.c.bf16 %v886_v57, %v885_v62 }
 0x1c7   :  { %v789_v4 = vpop.f32.mrf.mxu0 }
 0x1c8   :  { %v896_v9 = vmax.f32 %v788_v2, 0.0  ;;  %v764_v2 = vadd.f32 %v3481_v5, %v3632_v43 }
 0x1c9   :  { %v792_v11 = vpop.f32.mrf.mxu0 }
 0x1ca   :  { %v935_v12 = vpack.c.bf16 %v896_v9, %v895_v7  ;;  %v793_v14 = vadd.f32 %v3481_v5, %v792_v11  ;;  %v761_v7 = vadd.f32 %v3481_v5, %v3630_v40  ;;  %v888_v11 = vmax.f32 %v756_v29, 0.0 }
 0x1cb   :  { %v794_v13 = vpop.f32.mrf.mxu0 }
 0x1cc   :  { %999 = vrot.lane.b32.xlu0 %v935_v12, %s3198_s12  ;;  %v897_v24 = vmax.f32 %v793_v14, 0.0  ;;  %v890_v12 = vmax.f32 %v764_v2, 0.0  ;;  %v887_v14 = vmax.f32 %v753_v6, 0.0 }
 0x1cd   :  { %v795_v15 = vpop.f32.mrf.mxu0 }
 0x1ce   :  { %v796_v20 = vadd.f32 %v3481_v5, %v795_v15  ;;  %v889_v15 = vmax.f32 %v761_v7, 0.0  ;;  %v931_v40 = vpack.c.bf16 %v888_v11, %v887_v14 }
 0x1cf   :  { %v797_v22 = vpop.f32.mrf.mxu0 }
 0x1d0   :  { %v898_v26 = vmax.f32 %v796_v20, 0.0  ;;  %955 = vrot.lane.b32.xlu0 %v3562_v60, %s3196_s0  ;;  %v932_v20 = vpack.c.bf16 %v890_v12, %v889_v15 }
 0x1d1   :  { %v800_v27 = vpop.f32.mrf.mxu0 }
 0x1d2   :  { %v936_v34 = vpack.c.bf16 %v898_v26, %v897_v24  ;;  %v801_v42 = vadd.f32 %v3481_v5, %v800_v27  ;;  %v772_v27 = vadd.f32 %v3481_v5, %v3636_v47 }
 0x1d3   :  { %v802_v36 = vpop.f32.mrf.mxu0 }
 0x1d4   :  { %1001 = vrot.lane.b32.xlu1 %v936_v34, %s3198_s12  ;;  %v899_v54 = vmax.f32 %v801_v42, 0.0  ;;  %v892_v25 = vmax.f32 %v772_v27, 0.0  ;;  %v3090_v27 = vld [vmem:[%s4134_s3 + $0xb0] sm:$0xff]  }
 0x1d5   :  { %v803_v44 = vpop.f32.mrf.mxu0 }
 0x1d6   :  { %v804_v60 = vadd.f32 %v3481_v5, %v803_v44 }
 0x1d7   :  { %v805_v48 = vpop.f32.mrf.mxu0 }
 0x1d8   :  { %v900_v55 = vmax.f32 %v804_v60, 0.0  ;;  %979 = vrot.lane.b32.xlu1 %v929_v18, %s3197_s26 }
 0x1d9   :  { %v808_v56 = vpop.f32.mrf.mxu0 }
 0x1da   :  { %v937_v58 = vpack.c.bf16 %v900_v55, %v899_v54  ;;  %v809_v63 = vadd.f32 %v3481_v5, %v808_v56  ;;  %v777_v56 = vadd.f32 %v3481_v5, %v3638_v49 }
 0x1db   :  { %v810_v59 = vpop.f32.mrf.mxu0 }
 0x1dc   :  { %957 = vrot.lane.b32.xlu1 %v3566_v8, %s3196_s0  ;;  %1003 = vrot.lane.b32.xlu0 %v937_v58, %s3198_s12  ;;  %v901_v8 = vmax.f32 %v809_v63, 0.0  ;;  %v893_v63 = vmax.f32 %v777_v56, 0.0 }
 0x1dd   :  { %v811_v33 = vpop.f32.mrf.mxu0 }
 0x1de   :  { %v812_v3 = vadd.f32 %v3481_v5, %v811_v33 }
 0x1df   :  { %v813_v4 = vpop.f32.mrf.mxu0 }
 0x1e0   :  { %v902_v9 = vmax.f32 %v812_v3, 0.0  ;;  %961 = vrot.lane.b32.xlu1 %v3574_v30, %s3196_s0  ;;  %981 = vrot.lane.b32.xlu0 %v930_v1, %s3197_s26 }
 0x1e1   :  { %v816_v37 = vpop.f32.mrf.mxu0 }
 0x1e2   :  { %v938_v43 = vpack.c.bf16 %v902_v9, %v901_v8  ;;  %v817_v16 = vadd.f32 %v3481_v5, %v816_v37 }
 0x1e3   :  { %v818_v13 = vpop.f32.mrf.mxu0 }
 0x1e4   :  { %1005 = vrot.lane.b32.xlu1 %v938_v43, %s3198_s12  ;;  %959 = vrot.lane.b32.xlu0 %v3570_v19, %s3196_s0  ;;  %v903_v23 = vmax.f32 %v817_v16, 0.0  ;;  %v769_v19 = vadd.f32 %v3481_v5, %v3634_v45  ;;  %v780_v45 = vadd.f32 %v3481_v5, %v3640_v53 }
 0x1e5   :  { %v819_v35 = vpop.f32.mrf.mxu0 }
 0x1e6   :  { %v820_v30 = vadd.f32 %v3481_v5, %v819_v35  ;;  %v891_v18 = vmax.f32 %v769_v19, 0.0  ;;  %v894_v58 = vmax.f32 %v780_v45, 0.0 }
 0x1e7   :  { %v821_v22 = vpop.f32.mrf.mxu0 }
 0x1e8   :  { %v904_v24 = vmax.f32 %v820_v30, 0.0  ;;  %985 = vrot.lane.b32.xlu1 %v932_v20, %s3197_s26  ;;  %983 = vrot.lane.b32.xlu0 %v931_v40, %s3197_s26  ;;  %v933_v48 = vpack.c.bf16 %v892_v25, %v891_v18  ;;  %v934_v1 = vpack.c.bf16 %v894_v58, %v893_v63  ;;  %v3088_v22 = vld [vmem:[%s4134_s3 + $0xb8] sm:$0xff]   ;;  %v3098_v63 = vld [vmem:[%s4134_s3 + $0x90] sm:$0xff]  }
 0x1e9   :  { %v824_v26 = vpop.f32.mrf.mxu0 }
 0x1ea   :  { %v939_v32 = vpack.c.bf16 %v904_v24, %v903_v23  ;;  %v825_v36 = vadd.f32 %v3481_v5, %v824_v26 }
 0x1eb   :  { %v826_v34 = vpop.f32.mrf.mxu0 }
 0x1ec   :  { %1007 = vrot.lane.b32.xlu0 %v939_v32, %s3198_s12  ;;  %v905_v46 = vmax.f32 %v825_v36, 0.0  ;;  %v3091_v36 = vld [vmem:[%s4134_s3 + $0xe8] sm:$0xff]  }
 0x1ed   :  { %v827_v38 = vpop.f32.mrf.mxu0 }
 0x1ee   :  { %v828_v42 = vadd.f32 %v3481_v5, %v827_v38 }
 0x1ef   :  { %v829_v44 = vpop.f32.mrf.mxu0 }
 0x1f0   :  { %v906_v60 = vmax.f32 %v828_v42, 0.0  ;;  %963 = vrot.lane.b32.xlu0 %v3578_v41, %s3196_s0  ;;  %v3092_v42 = vld [vmem:[%s4134_s3 + $0xa8] sm:$0xff]  }
 0x1f1   :  { %v832_v47 = vpop.f32.mrf.mxu0 }
 0x1f2   :  { %v940_v52 = vpack.c.bf16 %v906_v60, %v905_v46  ;;  %v833_v54 = vadd.f32 %v3481_v5, %v832_v47  ;;  %v3093_v60 = vld [vmem:[%s4134_s3 + $0xe0] sm:$0xff]  }
 0x1f3   :  { %v834_v55 = vpop.f32.mrf.mxu0 }
 0x1f4   :  { %1009 = vrot.lane.b32.xlu1 %v940_v52, %s3198_s12  ;;  %987 = vrot.lane.b32.xlu0 %v933_v48, %s3197_s26  ;;  %v907_v59 = vmax.f32 %v833_v54, 0.0  ;;  %v3094_v48 = vld [vmem:[%s4134_s3 + $0xa0] sm:$0xff]   ;;  %v3095_v55 = vld [vmem:[%s4134_s3 + $0xd8] sm:$0xff]  }
 0x1f5   :  { %v835_v57 = vpop.f32.mrf.mxu0 }
 0x1f6   :  { %v836_v41 = vadd.f32 %v3481_v5, %v835_v57 }
 0x1f7   :  { %v837_v62 = vpop.f32.mrf.mxu0 }
 0x1f8   :  { %v908_v33 = vmax.f32 %v836_v41, 0.0  ;;  %965 = vrot.lane.b32.xlu1 %v3582_v51, %s3196_s0  ;;  %v952_v51 = vpop.permute.xlu0 %951  ;;  %v3097_v41 = vld [vmem:[%s4134_s3 + $0xd0] sm:$0xff]  }
 0x1f9   :  { %v840_v53 = vpop.f32.mrf.mxu0  ;;  %v1018_v13 = vsel %vm1015_vm0, %v3491_v17, %v952_v51 }
 0x1fa   :  { %v941_v29 = vpack.c.bf16 %v908_v33, %v907_v59  ;;  %v841_v49 = vadd.f32 %v3481_v5, %v840_v53 }
 0x1fb   :  { %v842_v2 = vpop.f32.mrf.mxu0 }
 0x1fc   :  { %989 = vrot.lane.b32.xlu1 %v934_v1, %s3197_s26  ;;  %1011 = vrot.lane.b32.xlu0 %v941_v29, %s3198_s12  ;;  %v909_v4 = vmax.f32 %v841_v49, 0.0  ;;  %v954_v37 = vpop.permute.xlu0 %953  ;;  %v3099_v1 = vld [vmem:[%s4134_s3 + $0xc8] sm:$0xff]  }
 0x1fd   :  { %v843_v3 = vpop.f32.mrf.mxu0 }
 0x1fe   :  { %v844_v6 = vadd.f32 %v3481_v5, %v843_v3  ;;  %v976_v11 = vpop.permute.xlu1 %975  ;;  %v1021_v5 = vsel %vm1015_vm0, %v3501_v28, %v954_v37  ;;  %v3089_v28 = vld [vmem:[%s4134_s3 + $0xf0] sm:$0xff]  }
 0x1ff   :  { %v845_v7 = vpop.f32.mrf.mxu0  ;;  %v1042_v14 = vsel %vm1040_vm1, %v1018_v13, %v976_v11 }
 0x200   :  { %v910_v8 = vmax.f32 %v844_v6, 0.0 }
 0x202   :  { %v942_v9 = vpack.c.bf16 %v910_v8, %v909_v4  ;;  %v3101_v4 = vld [vmem:[%s4134_s3 + $0xc0] sm:$0xff]  }
 0x204   :  { %1013 = vrot.lane.b32.xlu1 %v942_v9, %s3198_s12  ;;  %v3102_v9 = vld [vmem:[%s4134_s3 + $0x80] sm:$0xff]  }
 0x206   :  { %v978_v12 = vpop.permute.xlu1 %977 }
 0x207   :  { %v1044_v16 = vsel %vm1040_vm1, %v1021_v5, %v978_v12 }
 0x23e   :  { %v1000_v43 = vpop.permute.xlu0 %999 }
 0x23f   :  { %v1059_v15 = vsel %vm1057_vm2, %v1042_v14, %v1000_v43 }
 0x240   :  { %v1094_v20 = vrot.slane %v1059_v15, 4 }
 0x242   :  { %v956_v17 = vpop.permute.xlu0 %955 }
 0x243   :  { %v1024_v26 = vsel %vm1015_vm0, %v3511_v39, %v956_v17 }
 0x246   :  { %v1002_v35 = vpop.permute.xlu1 %1001 }
 0x247   :  { %v1062_v40 = vsel %vm1057_vm2, %v1044_v16, %v1002_v35 }
 0x248   :  { %v1095_v30 = vrot.slane %v1062_v40, 4 }
 0x24a   :  { %v980_v23 = vpop.permute.xlu1 %979  ;;  %v1096_v24 = vsel %vm1083_vm3, %v1094_v20, %v1095_v30 }
 0x24b   :  { %1416 = vmatprep.mubr.bf16.mxu1 %v1096_v24  ;;  %v1046_v32 = vsel %vm1040_vm1, %v1024_v26, %v980_v23  ;;  %v3104_v24 = vld [vmem:[%s4135_s5 + $0x38] sm:$0xff]   ;;  %v3106_v26 = vld [vmem:[%s4135_s5 + $0x30] sm:$0xff]  }
 0x24c   :  { %1417 = vmatmul.mubr.bf16.vlgmr.msra.gmra.mxu1 %v1059_v15 }
 0x24d   :  { %2803 = vmatpush3.bf16.msra.mxu1 %v3088_v22 }
 0x24e   :  { %v958_v34 = vpop.permute.xlu1 %957  ;;  %v1004_v19 = vpop.permute.xlu0 %1003  ;;  %2804 = vmatprep.subr.bf16.mxu1 %v3089_v28  ;;  %v3105_v28 = vld [vmem:[%s4135_s5 + $0x70] sm:$0xff]  }
 0x24f   :  { %v3753_v38 = vsel %vm1057_vm2, %v1046_v32, %v1004_v19  ;;  %v1027_v47 = vsel %vm1015_vm0, %v3521_v50, %v958_v34  ;;  %v3096_v50 = vld [vmem:[%s4134_s3 + $0x98] sm:$0xff]   ;;  %v3108_v32 = vld [vmem:[%s4135_s5 + $0x28] sm:$0xff]   ;;  %v3109_v34 = vld [vmem:[%s4135_s5 + $0x60] sm:$0xff]  }
 0x250   :  { %v1084_v25 = vrot.slane %v3753_v38, 4  ;;  %v1106_v39 = vsel %vm1083_vm3, %v1095_v30, %v3753_v38  ;;  %v3110_v19 = vld [vmem:[%s4135_s5 + $0x20] sm:$0xff]  }
 0x251   :  { %1424 = vmatprep.mubr.bf16.mxu1 %v1106_v39  ;;  %2805 = vmatpush3.bf16.msra.mxu1 %v3090_v27  ;;  %v3107_v27 = vld [vmem:[%s4135_s5 + $0x68] sm:$0xff]   ;;  %v3114_v39 = vld [vmem:[%s4135_s5 + $0x10] sm:$0xff]  }
 0x252   :  { %v962_v44 = vpop.permute.xlu1 %961  ;;  %v982_v18 = vpop.permute.xlu0 %981  ;;  %v1090_v46 = vsel %vm1083_vm3, %v1062_v40, %v1084_v25  ;;  %2806 = vmatprep.subr.bf16.mxu1 %v3091_v36  ;;  %v3111_v36 = vld [vmem:[%s4135_s5 + $0x58] sm:$0xff]  }
 0x253   :  { %v1048_v45 = vsel %vm1040_vm1, %v1027_v47, %v982_v18  ;;  %v1033_v8 = vsel %vm1015_vm0, %v3541_v10, %v962_v44 }
 0x254   :  { %1425 = vmatmul.mubr.bf16.gmra.mxu1 %v1090_v46 }
 0x255   :  { %2807 = vmatpush3.bf16.msra.mxu1 %v3092_v42  ;;  %v3115_v42 = vld [vmem:[%s4135_s5 + $0x48] sm:$0xff]  }
 0x256   :  { %v1006_v52 = vpop.permute.xlu1 %1005  ;;  %v960_v54 = vpop.permute.xlu0 %959  ;;  %2808 = vmatprep.subr.bf16.mxu1 %v3093_v60 }
 0x257   :  { %v1067_v56 = vsel %vm1057_vm2, %v1048_v45, %v1006_v52  ;;  %v1030_v62 = vsel %vm1015_vm0, %v3531_v61, %v960_v54  ;;  %v3100_v61 = vld [vmem:[%s4134_s3 + $0x88] sm:$0xff]  }
 0x258   :  { %v1085_v57 = vrot.slane %v1067_v56, 4  ;;  %1432 = vmatprep.mubr.bf16.mxu1 %v1067_v56 }
 0x259   :  { %2809 = vmatpush3.bf16.msra.mxu1 %v3094_v48 }
 0x25a   :  { %v984_v58 = vpop.permute.xlu0 %983  ;;  %v1086_v59 = vsel %vm1083_vm3, %v1084_v25, %v1085_v57  ;;  %2810 = vmatprep.subr.bf16.mxu1 %v3095_v55  ;;  %v986_v3 = vpop.permute.xlu1 %985  ;;  %v3113_v25 = vld [vmem:[%s4135_s5 + $0x50] sm:$0xff]  }
 0x25b   :  { %v1050_v33 = vsel %vm1040_vm1, %v1030_v62, %v984_v58  ;;  %v1052_v51 = vsel %vm1040_vm1, %v1033_v8, %v986_v3  ;;  %v3116_v8 = vld [vmem:[%s4135_s5 + $0x8] sm:$0xff]  }
 0x25c   :  { %1433 = vmatmul.mubr.bf16.gmra.mxu1 %v1086_v59 }
 0x25d   :  { %2811 = vmatpush3.bf16.msra.mxu1 %v3096_v50 }
 0x25e   :  { %v1008_v53 = vpop.permute.xlu0 %1007  ;;  %2812 = vmatprep.subr.bf16.mxu1 %v3097_v41 }
 0x25f   :  { %v1070_v29 = vsel %vm1057_vm2, %v1050_v33, %v1008_v53  ;;  %v3868_v53 = vld [vmem:[%s4136_s4] ss:$0 sm:$0xff] }
 0x260   :  { %v1100_v49 = vrot.slane %v1070_v29, 4  ;;  %v1119_v2 = vsel %vm1083_vm3, %v1085_v57, %v1070_v29 }
 0x261   :  { %2813 = vmatpush3.bf16.msra.mxu1 %v3098_v63 }
 0x262   :  { %2814 = vmatprep.subr.bf16.mxu1 %v3099_v1  ;;  %v1109_v6 = vsel %vm1083_vm3, %v1067_v56, %v1100_v49  ;;  %v964_v7 = vpop.permute.xlu0 %963 }
 0x263   :  { %v1036_v10 = vsel %vm1015_vm0, %v3548_v21, %v964_v7 }
 0x265   :  { %2815 = vmatpush3.bf16.msra.mxu1 %v3100_v61 }
 0x266   :  { %v1010_v37 = vpop.permute.xlu1 %1009  ;;  %2816 = vmatprep.subr.bf16.mxu1 %v3101_v4  ;;  %v988_v43 = vpop.permute.xlu0 %987 }
 0x267   :  { %v1073_v11 = vsel %vm1057_vm2, %v1052_v51, %v1010_v37  ;;  %v1054_v5 = vsel %vm1040_vm1, %v1036_v10, %v988_v43 }
 0x268   :  { %v1101_v12 = vrot.slane %v1073_v11, 4 }
 0x269   :  { %2817 = vmatpush3.bf16.msra.mxu1 %v3102_v9  ;;  %v3117_v9 = vld [vmem:[%s4135_s5 + $0x40] sm:$0xff]  }
 0x26a   :  { %v1102_v13 = vsel %vm1083_vm3, %v1100_v49, %v1101_v12  ;;  %v966_v14 = vpop.permute.xlu1 %965 }
 0x26b   :  { %1440 = vmatprep.mubr.bf16.mxu1 %v1102_v13  ;;  %v1039_v40 = vsel %vm1015_vm0, %v3552_v31, %v966_v14  ;;  %v3103_v31 = vld [vmem:[%s4135_s5 + $0x78] sm:$0xff]  }
 0x26c   :  { %1441 = vmatmul.mubr.bf16.gmra.mxu1 %v1070_v29  ;;  %2848 = vmatprep.subr.bf16.mxu1 %v3103_v31 }
 0x26d   :  { %1448 = vmatprep.mubr.bf16.mxu1 %v1101_v12 }
 0x26e   :  { %v1012_v15 = vpop.permute.xlu0 %1011  ;;  %v990_v35 = vpop.permute.xlu1 %989 }
 0x26f   :  { %v1076_v16 = vsel %vm1057_vm2, %v1054_v5, %v1012_v15  ;;  %v1056_v20 = vsel %vm1040_vm1, %v1039_v40, %v990_v35 }
 0x270   :  { %v1113_v17 = vrot.slane %v1076_v16, 4 }
 0x274   :  { %1449 = vmatmul.mubr.bf16.gmra.mxu1 %v1073_v11 }
 0x275   :  { %1488 = vmatprep.mubr.bf16.mxu1 %v1086_v59 }
 0x276   :  { %v1014_v30 = vpop.permute.xlu1 %1013 }
 0x277   :  { %v1079_v22 = vsel %vm1057_vm2, %v1056_v20, %v1014_v30  ;;  %v3119_v30 = vld [vmem:[%s4135_s5 + $0xf8] sm:$0xff]  }
 0x278   :  { %v1114_v23 = vrot.slane %v1079_v22, 4 }
 0x27a   :  { %v1115_v21 = vsel %vm1083_vm3, %v1113_v17, %v1114_v23 }
 0x27c   :  { %1489 = vmatmul.mubr.bf16.vlgmr.msra.gmra.mxu1 %v3753_v38  ;;  %v3112_v38 = vld [vmem:[%s4135_s5 + $0x18] sm:$0xff]  }
 0x27d   :  { %1496 = vmatprep.mubr.bf16.mxu1 %v1119_v2  ;;  %2849 = vmatpush3.bf16.msra.mxu1 %v3104_v24 }
 0x27e   :  { %2850 = vmatprep.subr.bf16.mxu1 %v3105_v28 }
 0x281   :  { %2851 = vmatpush3.bf16.msra.mxu1 %v3106_v26 }
 0x282   :  { %2852 = vmatprep.subr.bf16.mxu1 %v3107_v27 }
 0x284   :  { %1497 = vmatmul.mubr.bf16.gmra.mxu1 %v1109_v6 }
 0x285   :  { %1504 = vmatprep.mubr.bf16.mxu1 %v1073_v11  ;;  %2853 = vmatpush3.bf16.msra.mxu1 %v3108_v32  ;;  %v3118_v11 = vld [vmem:[%s4135_s5] sm:$0xff]  }
 0x286   :  { %2854 = vmatprep.subr.bf16.mxu1 %v3109_v34 }
 0x289   :  { %2855 = vmatpush3.bf16.msra.mxu1 %v3110_v19 }
 0x28a   :  { %2856 = vmatprep.subr.bf16.mxu1 %v3111_v36 }
 0x28c   :  { %1505 = vmatmul.mubr.bf16.gmra.mxu1 %v1102_v13 }
 0x28d   :  { %1512 = vmatprep.mubr.bf16.mxu1 %v1115_v21  ;;  %2857 = vmatpush3.bf16.msra.mxu1 %v3112_v38 }
 0x28e   :  { %2858 = vmatprep.subr.bf16.mxu1 %v3113_v25 }
 0x291   :  { %2859 = vmatpush3.bf16.msra.mxu1 %v3114_v39 }
 0x292   :  { %2860 = vmatprep.subr.bf16.mxu1 %v3115_v42 }
 0x294   :  { %1513 = vmatmul.mubr.bf16.gmra.mxu1 %v1076_v16 }
 0x295   :  { %1520 = vmatprep.mubr.bf16.mxu1 %v1114_v23  ;;  %2861 = vmatpush3.bf16.msra.mxu1 %v3116_v8 }
 0x296   :  { %2862 = vmatprep.subr.bf16.mxu1 %v3117_v9 }
 0x299   :  { %2863 = vmatpush3.bf16.msra.mxu1 %v3118_v11 }
 0x29a   :  { %2870 = vmatprep.subr.bf16.mxu1 %v3119_v30  ;;  %v3127_v30 = vld [vmem:[%s4135_s5 + $0xd8] sm:$0xff]  }
 0x29c   :  { %1521 = vmatmul.mubr.bf16.gmra.mxu1 %v1079_v22 }
 0x30c   :  { %v2772_v44 = vpop.f32.mrf.mxu1 }
 0x30e   :  { %v2773_v18 = vpop.f32.mrf.mxu1 }
 0x30f   :  { %v2774_v61 = vadd.f32 %v2773_v18, %v2772_v44 }
 0x310   :  { %v2775_v46 = vpop.f32.mrf.mxu1 }
 0x311   :  { %v1419_v51 = vadd.f32 %v2774_v61, %v3868_v53 }
 0x312   :  { %v2776_v60 = vpop.f32.mrf.mxu1 }
 0x313   :  { %v2777_v4 = vadd.f32 %v2776_v60, %v2775_v46 }
 0x314   :  { %v2778_v47 = vpop.f32.mrf.mxu1 }
 0x315   :  { %v1422_v12 = vadd.f32 %v2777_v4, %v3868_v53 }
 0x316   :  { %v2779_v48 = vpop.f32.mrf.mxu1 }
 0x317   :  { %v2780_v10 = vadd.f32 %v2779_v48, %v2778_v47 }
 0x318   :  { %v2781_v45 = vpop.f32.mrf.mxu1 }
 0x319   :  { %v1427_v17 = vadd.f32 %v2780_v10, %v3868_v53 }
 0x31a   :  { %v2782_v52 = vpop.f32.mrf.mxu1 }
 0x31b   :  { %v2783_v16 = vadd.f32 %v2782_v52, %v2781_v45 }
 0x31c   :  { %v2784_v54 = vpop.f32.mrf.mxu1 }
 0x31d   :  { %v1430_v31 = vadd.f32 %v2783_v16, %v3868_v53  ;;  %v3123_v16 = vld [vmem:[%s4135_s5 + $0xe8] sm:$0xff]  }
 0x31e   :  { %v2785_v55 = vpop.f32.mrf.mxu1 }
 0x31f   :  { %v2786_v32 = vadd.f32 %v2785_v55, %v2784_v54 }
 0x320   :  { %v2787_v56 = vpop.f32.mrf.mxu1 }
 0x321   :  { %v1435_v44 = vadd.f32 %v2786_v32, %v3868_v53 }
 0x322   :  { %v2788_v57 = vpop.f32.mrf.mxu1 }
 0x323   :  { %v2789_v36 = vadd.f32 %v2788_v57, %v2787_v56 }
 0x325   :  { %v1438_v60 = vadd.f32 %v2789_v36, %v3868_v53 }
 0x32c   :  { %v3857_v50 = vpop.f32.mrf.mxu1 }
 0x32e   :  { %v3859_v58 = vpop.f32.mrf.mxu1 }
 0x32f   :  { %v2792_v54 = vadd.f32 %v3859_v58, %v3857_v50 }
 0x330   :  { %v3861_v59 = vpop.f32.mrf.mxu1 }
 0x332   :  { %v3863_v41 = vpop.f32.mrf.mxu1 }
 0x333   :  { %v2795_v57 = vadd.f32 %v3863_v41, %v3861_v59 }
 0x334   :  { %v2796_v62 = vpop.f32.mrf.mxu1 }
 0x336   :  { %v2797_v63 = vpop.f32.mrf.mxu1 }
 0x337   :  { %v2798_v33 = vadd.f32 %v2797_v63, %v2796_v62 }
 0x338   :  { %v2799_v1 = vpop.f32.mrf.mxu1 }
 0x339   :  { %v3871_v29 = vadd.f32 %v2798_v33, %v3868_v53 }
 0x33a   :  { %v2800_v49 = vpop.f32.mrf.mxu1 }
 0x33b   :  { %v1443_v49 = vadd.f32 %v2792_v54, %v3868_v53  ;;  %v3148_v54 = vld [vmem:[%s4137_s7] ss:$16 sps:$4 sm:$0xff]  }
 0x33c   :  { %v2818_v2 = vpop.f32.mrf.mxu1 }
 0x33e   :  { %v2819_v3 = vpop.f32.mrf.mxu1 }
 0x33f   :  { %v2820_v6 = vadd.f32 %v2819_v3, %v2818_v2  ;;  %v1446_v3 = vadd.f32 %v2795_v57, %v3868_v53 }
 0x340   :  { %v2821_v7 = vpop.f32.mrf.mxu1 }
 0x341   :  { %v1491_v43 = vadd.f32 %v2820_v6, %v1419_v51 }
 0x342   :  { %v2822_v37 = vpop.f32.mrf.mxu1 }
 0x343   :  { %v2823_v13 = vadd.f32 %v2822_v37, %v2821_v7  ;;  %v1528_v35 = vmax.f32 %v1491_v43, 0.0 }
 0x344   :  { %v2824_v14 = vpop.f32.mrf.mxu1 }
 0x345   :  { %v1494_v5 = vadd.f32 %v2823_v13, %v1422_v12 }
 0x346   :  { %v2825_v15 = vpop.f32.mrf.mxu1 }
 0x347   :  { %v1529_v40 = vmax.f32 %v1494_v5, 0.0  ;;  %v2826_v20 = vadd.f32 %v2825_v15, %v2824_v14  ;;  %v3120_v14 = vld [vmem:[%s4135_s5 + $0xb8] sm:$0xff]   ;;  %v3121_v5 = vld [vmem:[%s4135_s5 + $0xf0] sm:$0xff]  }
 0x348   :  { %v2827_v22 = vpop.f32.mrf.mxu1 }
 0x349   :  { %v1537_v23 = vpack.c.bf16 %v1529_v40, %v1528_v35  ;;  %v1499_v24 = vadd.f32 %v2826_v20, %v1427_v17  ;;  %v3124_v35 = vld [vmem:[%s4135_s5 + $0xa8] sm:$0xff]   ;;  %v3125_v40 = vld [vmem:[%s4135_s5 + $0xe0] sm:$0xff]   ;;  %v3128_v17 = vld [vmem:[%s4135_s5 + $0x98] sm:$0xff]  }
 0x34a   :  { %v2828_v21 = vpop.f32.mrf.mxu1  ;;  %v3126_v20 = vld [vmem:[%s4135_s5 + $0xa0] sm:$0xff]  }
 0x34b   :  { %v2829_v28 = vadd.f32 %v2828_v21, %v2827_v22  ;;  %v1543_v26 = vrot.slane %v1537_v23, 4  ;;  %v1530_v38 = vmax.f32 %v1499_v24, 0.0  ;;  %v3129_v21 = vld [vmem:[%s4135_s5 + $0xd0] sm:$0xff]   ;;  %v3131_v24 = vld [vmem:[%s4135_s5 + $0xc8] sm:$0xff]  }
 0x34c   :  { %v2830_v27 = vpop.f32.mrf.mxu1 }
 0x34d   :  { %v1502_v34 = vadd.f32 %v2829_v28, %v1430_v31  ;;  %1544 = vrot.lane.b32.xlu1 %v1543_v26, %s3197_s26  ;;  %v3130_v31 = vld [vmem:[%s4135_s5 + $0x90] sm:$0xff]   ;;  %v3132_v28 = vld [vmem:[%s4135_s5 + $0x88] sm:$0xff]   ;;  %v3133_v26 = vld [vmem:[%s4135_s5 + $0xc0] sm:$0xff]  }
 0x34e   :  { %v2831_v19 = vpop.f32.mrf.mxu1 }
 0x34f   :  { %v1531_v25 = vmax.f32 %v1502_v34, 0.0  ;;  %v2832_v39 = vadd.f32 %v2831_v19, %v2830_v27  ;;  %v3134_v27 = vld [vmem:[%s4135_s5 + $0x80] sm:$0xff]   ;;  %v3135_v34 = vld [vmem:[%s4135_s5 + $0x118] sm:$0xff]   ;;  %v3199_v19 = vmov 0.0  }
 0x350   :  { %v2833_v42 = vpop.f32.mrf.mxu1 }
 0x351   :  { %v1538_v18 = vpack.c.bf16 %v1531_v25, %v1530_v38  ;;  %v1507_v47 = vadd.f32 %v2832_v39, %v1435_v44  ;;  %v3136_v38 = vld [vmem:[%s4135_s5 + $0x110] sm:$0xff]   ;;  %v3137_v25 = vld [vmem:[%s4135_s5 + $0x108] sm:$0xff]   ;;  %v3138_v39 = vld [vmem:[%s4135_s5 + $0x100] sm:$0xff]  }
 0x352   :  { %v2834_v46 = vpop.f32.mrf.mxu1 }
 0x353   :  { %v2835_v48 = vadd.f32 %v2834_v46, %v2833_v42  ;;  %v1547_v45 = vrot.slane %v1538_v18, 4  ;;  %v1532_v62 = vmax.f32 %v1507_v47, 0.0  ;;  %v3139_v46 = vld [vmem:[%s4137_s7 + $0x60] ss:$16 sps:$4 sm:$0xff]  }
 0x354   :  { %v2836_v52 = vpop.f32.mrf.mxu1  ;;  %v3142_v47 = vld [vmem:[%s4137_s7 + $0x40] ss:$16 sps:$4 sm:$0xff]  }
 0x355   :  { %v1510_v55 = vadd.f32 %v2835_v48, %v1438_v60  ;;  %1548 = vrot.lane.b32.xlu0 %v1547_v45, %s3197_s26  ;;  %v3144_v60 = vld [vmem:[%s4137_s7 + $0x44] ss:$16 sps:$4 sm:$0xff]   ;;  %v3145_v45 = vld [vmem:[%s4137_s7 + $0x20] ss:$16 sps:$4 sm:$0xff]  }
 0x356   :  { %v2837_v56 = vpop.f32.mrf.mxu1  ;;  %v3147_v48 = vld [vmem:[%s4137_s7 + $0x24] ss:$16 sps:$4 sm:$0xff]  }
 0x357   :  { %v1533_v63 = vmax.f32 %v1510_v55, 0.0  ;;  %v2838_v33 = vadd.f32 %v2837_v56, %v2836_v52  ;;  %v3150_v52 = vld [vmem:[%s4137_s7 + $0x4] ss:$16 sps:$4 sm:$0xff]   ;;  %v3153_v55 = vld [vmem:[%s4137_s7 + $0x6c] ss:$16 sps:$4 sm:$0xff]  }
 0x358   :  { %v2839_v1 = vpop.f32.mrf.mxu1 }
 0x359   :  { %v3898_v2 = vpack.c.bf16 %v1533_v63, %v1532_v62  ;;  %v1515_v4 = vadd.f32 %v2838_v33, %v1443_v49 }
 0x35a   :  { %v2840_v61 = vpop.f32.mrf.mxu1 }
 0x35b   :  { %v2841_v50 = vadd.f32 %v2840_v61, %v2839_v1  ;;  %v1551_v58 = vrot.slane %v3898_v2, 4  ;;  %v1534_v41 = vmax.f32 %v1515_v4, 0.0 }
 0x35c   :  { %v2842_v6 = vpop.f32.mrf.mxu1 }
 0x35d   :  { %v1518_v7 = vadd.f32 %v2841_v50, %v1446_v3  ;;  %1552 = vrot.lane.b32.xlu1 %v1551_v58, %s3197_s26  ;;  %v2667_v3 = vld [vmem:[%s4139_s6] ss:$0 sm:$0xff] }
 0x35e   :  { %v2843_v59 = vpop.f32.mrf.mxu1 }
 0x35f   :  { %v1535_v8 = vmax.f32 %v1518_v7, 0.0  ;;  %v2844_v9 = vadd.f32 %v2843_v59, %v2842_v6 }
 0x360   :  { %v2845_v51 = vpop.f32.mrf.mxu1 }
 0x361   :  { %v1540_v37 = vpack.c.bf16 %v1535_v8, %v1534_v41  ;;  %v3904_v11 = vadd.f32 %v2844_v9, %v3871_v29  ;;  %v3122_v29 = vld [vmem:[%s4135_s5 + $0xb0] sm:$0xff]   ;;  %v3151_v9 = vld [vmem:[%s4137_s7 + $0x68] ss:$16 sps:$4 sm:$0xff]  }
 0x362   :  { %v2846_v12 = vpop.f32.mrf.mxu1 }
 0x363   :  { %v1555_v43 = vrot.slane %v1540_v37, 4  ;;  %v1536_v42 = vmax.f32 %v3904_v11, 0.0  ;;  %v3154_v12 = vld [vmem:[%s4137_s7 + $0x48] ss:$16 sps:$4 sm:$0xff]  }
 0x365   :  { %1556 = vrot.lane.b32.xlu0 %v1555_v43, %s3197_s26  ;;  %v1541_v44 = vpack.c.bf16 %v1536_v42, %v1536_v42  ;;  %v3159_v43 = vld [vmem:[%s4137_s7 + $0x2c] ss:$16 sps:$4 sm:$0xff]  }
 0x3bf   :  { %v1545_v53 = vpop.permute.xlu1 %1544 }
 0x3c0   :  { %v1560_v15 = vsel %vm1040_vm1, %v1537_v23, %v1545_v53  ;;  %v3157_v53 = vld [vmem:[%s4137_s7 + $0x28] ss:$16 sps:$4 sm:$0xff]  }
 0x3c7   :  { %v1549_v13 = vpop.permute.xlu0 %1548 }
 0x3c8   :  { %v1564_v10 = vsel %vm1040_vm1, %v1538_v18, %v1549_v13  ;;  %v3141_v18 = vld [vmem:[%s4137_s7 + $0x64] ss:$16 sps:$4 sm:$0xff]   ;;  %v3162_v13 = vld [vmem:[%s4137_s7 + $0xc] ss:$16 sps:$4 sm:$0xff]  }
 0x3c9   :  { %1904 = vmatprep.mubr.bf16.mxu1 %v1564_v10  ;;  %v3164_v10 = vld [vmem:[%s4138_s9 + $0x38] sm:$0xff]  }
 0x3ca   :  { %1905 = vmatmul.mubr.bf16.vlgmr.msra.gmra.mxu1 %v1560_v15  ;;  %v3166_v15 = vld [vmem:[%s4138_s9 + $0x30] sm:$0xff]  }
 0x3cb   :  { %2871 = vmatpush3.bf16.msra.mxu1 %v3120_v14  ;;  %v3163_v14 = vld [vmem:[%s4138_s9 + $0x78] sm:$0xff]  }
 0x3cc   :  { %2872 = vmatprep.subr.bf16.mxu1 %v3121_v5  ;;  %v3165_v5 = vld [vmem:[%s4138_s9 + $0x70] sm:$0xff]  }
 0x3cf   :  { %2873 = vmatpush3.bf16.msra.mxu1 %v3122_v29  ;;  %v1553_v32 = vpop.permute.xlu1 %1552  ;;  %v3167_v29 = vld [vmem:[%s4138_s9 + $0x68] sm:$0xff]  }
 0x3d0   :  { %2874 = vmatprep.subr.bf16.mxu1 %v3123_v16  ;;  %v1568_v36 = vsel %vm1040_vm1, %v3898_v2, %v1553_v32  ;;  %v3168_v16 = vld [vmem:[%s4138_s9 + $0x28] sm:$0xff]  }
 0x3d3   :  { %2875 = vmatpush3.bf16.msra.mxu1 %v3124_v35  ;;  %v3169_v35 = vld [vmem:[%s4138_s9 + $0x60] sm:$0xff]  }
 0x3d4   :  { %2876 = vmatprep.subr.bf16.mxu1 %v3125_v40  ;;  %v3170_v40 = vld [vmem:[%s4138_s9 + $0x20] sm:$0xff]  }
 0x3d7   :  { %2877 = vmatpush3.bf16.msra.mxu1 %v3126_v20  ;;  %v1557_v22 = vpop.permute.xlu0 %1556  ;;  %v3171_v20 = vld [vmem:[%s4138_s9 + $0x58] sm:$0xff]  }
 0x3d8   :  { %2878 = vmatprep.subr.bf16.mxu1 %v3127_v30  ;;  %v1572_v23 = vsel %vm1040_vm1, %v1540_v37, %v1557_v22  ;;  %v3156_v37 = vld [vmem:[%s4137_s7 + $0x4c] ss:$16 sps:$4 sm:$0xff]   ;;  %v3173_v22 = vld [vmem:[%s4138_s9 + $0x50] sm:$0xff]  }
 0x3d9   :  { %1944 = vmatprep.mubr.bf16.mxu1 %v1572_v23  ;;  %v3172_v30 = vld [vmem:[%s4138_s9 + $0x18] sm:$0xff]   ;;  %v3175_v23 = vld [vmem:[%s4138_s9 + $0x48] sm:$0xff]  }
 0x3db   :  { %2879 = vmatpush3.bf16.msra.mxu1 %v3128_v17  ;;  %v3174_v17 = vld [vmem:[%s4138_s9 + $0x10] sm:$0xff]  }
 0x3dc   :  { %2880 = vmatprep.subr.bf16.mxu1 %v3129_v21  ;;  %v3176_v21 = vld [vmem:[%s4138_s9 + $0x8] sm:$0xff]  }
 0x3df   :  { %2881 = vmatpush3.bf16.msra.mxu1 %v3130_v31  ;;  %v3177_v31 = vld [vmem:[%s4138_s9 + $0x40] sm:$0xff]  }
 0x3e0   :  { %2882 = vmatprep.subr.bf16.mxu1 %v3131_v24  ;;  %v3178_v24 = vld [vmem:[%s4138_s9] sm:$0xff]  }
 0x3e3   :  { %2883 = vmatpush3.bf16.msra.mxu1 %v3132_v28  ;;  %v3179_v28 = vld [vmem:[%s4138_s9 + $0xf8] sm:$0xff]  }
 0x3e4   :  { %2884 = vmatprep.subr.bf16.mxu1 %v3133_v26  ;;  %v2012_v26 = vlaneseq }
 0x3e7   :  { %2885 = vmatpush3.bf16.msra.mxu1 %v3134_v27  ;;  %v2013_v27 = vshrl.u32 %v2012_v26, 7 }
 0x3e8   :  { %2941 = vmatprep.subr.bf16.mxu1 %v3199_v19 }
 0x3e9   :  { %v2014_v32 = vsub.s32 0, %v2013_v27 }
 0x3ea   :  { %1945 = vmatmul.mubr.bf16.vlgmr.msra.gmra.mxu1 %v1568_v36 }
 0x3eb   :  { %2942 = vmatpush3.bf16.msra.mxu1 %v3135_v34  ;;  %2949 = vmatprep.mubr.msk.bf16.mxu1 %vm3200_vm4, %v3199_v19  ;;  %v2010_v34 = vld [vmem:[%s4140_s8] sm:$0xf] }
 0x3ec   :  { %2943 = vmatprep.subr.bf16.mxu1 %v3199_v19  ;;  %v2015_v36 = vrot.slane %v2010_v34, %v2014_v32 }
 0x3ef   :  { %2944 = vmatpush3.bf16.msra.mxu1 %v3136_v38 }
 0x3f0   :  { %2945 = vmatprep.subr.bf16.mxu1 %v3199_v19 }
 0x3f3   :  { %2946 = vmatpush3.bf16.msra.mxu1 %v3137_v25 }
 0x3f4   :  { %2947 = vmatprep.subr.bf16.mxu1 %v3199_v19  ;;  %v2018_v19 = vsub.s32 1, %v2013_v27 }
 0x3f6   :  { %v2019_v38 = vrot.slane %v2010_v34, %v2018_v19 }
 0x3f7   :  { %2948 = vmatpush3.bf16.msra.mxu1 %v3138_v39 }
 0x3f8   :  { %2123 = vmatprep.subr.bf16.mxu1 %v3141_v18 }
 0x3fa   :  { %2950 = vmatmul.mubr.msk.bf16.vlgmr.msra.gmra.mxu1 %vm1040_vm1, %v1541_v44 }
 0x3fb   :  { %2147 = vmatprep.mubr.bf16.mxu1 %v3195_v0  ;;  %2124 = vmatpush1.bf16.msra.mxu1 %v3139_v46 }
 0x3fc   :  { %2125 = vmatprep.subr.bf16.mxu1 %v3144_v60 }
 0x3ff   :  { %2126 = vmatpush1.bf16.msra.mxu1 %v3142_v47 }
 0x400   :  { %2127 = vmatprep.subr.bf16.mxu1 %v3147_v48 }
 0x403   :  { %2128 = vmatpush1.bf16.msra.mxu1 %v3145_v45  ;;  %v3180_v45 = vld [vmem:[%s4138_s9 + $0xb8] sm:$0xff]  }
 0x404   :  { %2129 = vmatprep.subr.bf16.mxu1 %v3150_v52 }
 0x407   :  { %2130 = vmatpush1.bf16.msra.mxu1 %v3148_v54  ;;  %v3181_v54 = vld [vmem:[%s4138_s9 + $0xf0] sm:$0xff]  }
 0x408   :  { %2164 = vmatprep.subr.bf16.mxu1 %v3153_v55  ;;  %v3182_v55 = vld [vmem:[%s4138_s9 + $0xb0] sm:$0xff]  }
 0x48a   :  { %v2864_v56 = vpop.f32.mrf.mxu1 }
 0x48c   :  { %v2865_v57 = vpop.f32.mrf.mxu1 }
 0x48d   :  { %v2866_v61 = vadd.f32 %v2865_v57, %v2864_v56  ;;  %v2026_v56 = vsub.s32 3, %v2013_v27  ;;  %v3183_v57 = vld [vmem:[%s4138_s9 + $0xe8] sm:$0xff]  }
 0x48e   :  { %v2867_v62 = vpop.f32.mrf.mxu1 }
 0x48f   :  { %v1907_v50 = vadd.f32 %v2866_v61, %v2667_v3  ;;  %v2027_v62 = vrot.slane %v2010_v34, %v2026_v56  ;;  %v3186_v61 = vld [vmem:[%s4138_s9 + $0xa0] sm:$0xff]  }
 0x490   :  { %v2868_v63 = vpop.f32.mrf.mxu1 }
 0x491   :  { %v3184_v63 = vld [vmem:[%s4138_s9 + $0xa8] sm:$0xff]  }
 0x4aa   :  { %v2886_v33 = vpop.f32.mrf.mxu1 }
 0x4ac   :  { %v2887_v1 = vpop.f32.mrf.mxu1 }
 0x4ad   :  { %v2888_v4 = vadd.f32 %v2887_v1, %v2886_v33  ;;  %v3185_v1 = vld [vmem:[%s4138_s9 + $0xe0] sm:$0xff]  }
 0x4ae   :  { %v2889_v49 = vpop.f32.mrf.mxu1 }
 0x4af   :  { %v1947_v58 = vadd.f32 %v2888_v4, %v1907_v50  ;;  %v3187_v4 = vld [vmem:[%s4138_s9 + $0xd8] sm:$0xff]  }
 0x4b0   :  { %v2890_v2 = vpop.f32.mrf.mxu1 }
 0x4ba   :  { %v1986_v6 = vpop.f32.mrf.mxu1 }
 0x4bb   :  { %v1987_v7 = vadd.f32 %v1986_v6, %v1947_v58 }
 0x4bc   :  { %v2951_v59 = vpop.f32.mrf.mxu1 }
 0x4bd   :  { %v1992_v41 = vmax.f32 %v1987_v7, 0.0  ;;  %v3188_v7 = vld [vmem:[%s4138_s9 + $0x98] sm:$0xff]   ;;  %v2022_v59 = vsub.s32 2, %v2013_v27 }
 0x4be   :  { %v1989_v8 = vpop.f32.mrf.mxu1 }
 0x4bf   :  { %v1993_v51 = vpack.c.bf16 %v1992_v41, %v1992_v41  ;;  %v3189_v41 = vld [vmem:[%s4138_s9 + $0xd0] sm:$0xff]  }
 0x4c0   :  { %v2952_v11 = vpop.f32.mrf.mxu1  ;;  %v3190_v8 = vld [vmem:[%s4138_s9 + $0x90] sm:$0xff]  }
 0x4c1   :  { %2721 = vmatmul.mubr.msk.bf16.vlgmr.msra.gmra.mxu1 %vm1040_vm1, %v1993_v51 }
 0x4c2   :  { %2165 = vmatpush1.bf16.msra.mxu1 %v3151_v9  ;;  %2188 = vmatprep.mubr.bf16.mxu1 %v3195_v0  ;;  %v3160_v0 = vld [vmem:[%s4137_s7 + $0x8] ss:$16 sps:$4 sm:$0xff]   ;;  %v2023_v9 = vrot.slane %v2010_v34, %v2022_v59 }
 0x4c3   :  { %2166 = vmatprep.subr.bf16.mxu1 %v3156_v37  ;;  %v3192_v37 = vld [vmem:[%s4138_s9 + $0x88] sm:$0xff]  }
 0x4c6   :  { %2167 = vmatpush1.bf16.msra.mxu1 %v3154_v12  ;;  %v3193_v12 = vld [vmem:[%s4138_s9 + $0xc0] sm:$0xff]  }
 0x4c7   :  { %2168 = vmatprep.subr.bf16.mxu1 %v3159_v43  ;;  %v3194_v43 = vld [vmem:[%s4138_s9 + $0x80] sm:$0xff]  }
 0x4ca   :  { %2169 = vmatpush1.bf16.msra.mxu1 %v3157_v53 }
 0x4cb   :  { %2170 = vmatprep.subr.bf16.mxu1 %v3162_v13 }
 0x4ce   :  { %2171 = vmatpush1.bf16.msra.mxu1 %v3160_v0 }
 0x4cf   :  { %2897 = vmatprep.subr.bf16.mxu1 %v3163_v14 }
 0x4d1   :  { %2722 = vmatmul.mubr.msk.bf16.vlgmr.msra.gmra.mxu1 %vm1040_vm1, %v1993_v51  ;;  %v3191_v51 = vld [vmem:[%s4138_s9 + $0xc8] sm:$0xff]  }
 0x4d2   :  { %2898 = vmatpush3.bf16.msra.mxu1 %v3164_v10 }
 0x4d3   :  { %2899 = vmatprep.subr.bf16.mxu1 %v3165_v5 }
 0x4d6   :  { %2900 = vmatpush3.bf16.msra.mxu1 %v3166_v15 }
 0x4d7   :  { %2901 = vmatprep.subr.bf16.mxu1 %v3167_v29  ;;  %v2723_v29 = vld [vmem:[%s4141_s10] ss:$0 sm:$0xff] }
 0x4da   :  { %2902 = vmatpush3.bf16.msra.mxu1 %v3168_v16 }
 0x4db   :  { %2903 = vmatprep.subr.bf16.mxu1 %v3169_v35 }
 0x4de   :  { %2904 = vmatpush3.bf16.msra.mxu1 %v3170_v40 }
 0x4df   :  { %2905 = vmatprep.subr.bf16.mxu1 %v3171_v20 }
 0x4e2   :  { %2906 = vmatpush3.bf16.msra.mxu1 %v3172_v30 }
 0x4e3   :  { %2907 = vmatprep.subr.bf16.mxu1 %v3173_v22 }
 0x4e6   :  { %2908 = vmatpush3.bf16.msra.mxu1 %v3174_v17 }
 0x4e7   :  { %2909 = vmatprep.subr.bf16.mxu1 %v3175_v23 }
 0x4ea   :  { %2910 = vmatpush3.bf16.msra.mxu1 %v3176_v21 }
 0x4eb   :  { %2911 = vmatprep.subr.bf16.mxu1 %v3177_v31 }
 0x4ee   :  { %2912 = vmatpush3.bf16.msra.mxu1 %v3178_v24 }
 0x4ef   :  { %2919 = vmatprep.subr.bf16.mxu1 %v3179_v28 }
 0x581   :  { %v2149_v25 = vpop.f32.mrf.mxu1 }
 0x582   :  { %v2150_v39 = vadd.f32 %v2149_v25, %v2015_v36 }
 0x583   :  { %v2151_v42 = vpop.f32.mrf.mxu1 }
 0x584   :  { %v2152_v44 = vadd.f32 %v2151_v42, %v2019_v38  ;;  %v2197_v18 = vmax.f32 %v2150_v39, 0.0 }
 0x585   :  { %v2153_v46 = vpop.f32.mrf.mxu1 }
 0x586   :  { %v2198_v60 = vmax.f32 %v2152_v44, 0.0  ;;  %v2201_v52 = vpack.c.bf16 %v2197_v18, %v2197_v18 }
 0x587   :  { %v2154_v47 = vpop.f32.mrf.mxu1 }
 0x588   :  { %v2202_v48 = vpack.c.bf16 %v2198_v60, %v2198_v60 }
 0x58a   :  { %2500 = vmatprep.mubr.bf16.mxu1 %v2202_v48 }
 0x58b   :  { %2501 = vmatmul.mubr.bf16.vlgmr.msra.gmra.mxu1 %v2201_v52 }
 0x58c   :  { %2920 = vmatpush3.bf16.msra.mxu1 %v3180_v45 }
 0x58d   :  { %2921 = vmatprep.subr.bf16.mxu1 %v3181_v54 }
 0x590   :  { %2922 = vmatpush3.bf16.msra.mxu1 %v3182_v55 }
 0x591   :  { %v2190_v33 = vpop.f32.mrf.mxu1  ;;  %2923 = vmatprep.subr.bf16.mxu1 %v3183_v57 }
 0x592   :  { %v2191_v11 = vadd.f32 %v2190_v33, %v2023_v9 }
 0x593   :  { %v2192_v49 = vpop.f32.mrf.mxu1 }
 0x594   :  { %v2193_v2 = vadd.f32 %v2192_v49, %v2027_v62  ;;  %2924 = vmatpush3.bf16.msra.mxu1 %v3184_v63  ;;  %v2199_v53 = vmax.f32 %v2191_v11, 0.0 }
 0x595   :  { %v2194_v3 = vpop.f32.mrf.mxu1  ;;  %2925 = vmatprep.subr.bf16.mxu1 %v3185_v1 }
 0x596   :  { %v2200_v50 = vmax.f32 %v2193_v2, 0.0  ;;  %v2203_v13 = vpack.c.bf16 %v2199_v53, %v2199_v53 }
 0x597   :  { %v2195_v58 = vpop.f32.mrf.mxu1 }
 0x598   :  { %v2204_v6 = vpack.c.bf16 %v2200_v50, %v2200_v50  ;;  %2926 = vmatpush3.bf16.msra.mxu1 %v3186_v61 }
 0x599   :  { %2927 = vmatprep.subr.bf16.mxu1 %v3187_v4 }
 0x59a   :  { %2540 = vmatprep.mubr.bf16.mxu1 %v2204_v6 }
 0x59c   :  { %2928 = vmatpush3.bf16.msra.mxu1 %v3188_v7 }
 0x59d   :  { %2929 = vmatprep.subr.bf16.mxu1 %v3189_v41 }
 0x5a0   :  { %2930 = vmatpush3.bf16.msra.mxu1 %v3190_v8 }
 0x5a1   :  { %2931 = vmatprep.subr.bf16.mxu1 %v3191_v51 }
 0x5a4   :  { %2932 = vmatpush3.bf16.msra.mxu1 %v3192_v37 }
 0x5a5   :  { %2933 = vmatprep.subr.bf16.mxu1 %v3193_v12 }
 0x5a8   :  { %2934 = vmatpush3.bf16.msra.mxu1 %v3194_v43 }
 0x5ab   :  { %2541 = vmatmul.mubr.bf16.vlgmr.msra.gmra.mxu1 %v2203_v13 }
 0x64b   :  { %v2913_v0 = vpop.f32.mrf.mxu1 }
 0x64d   :  { %v2914_v14 = vpop.f32.mrf.mxu1 }
 0x64e   :  { %v2915_v15 = vadd.f32 %v2914_v14, %v2913_v0 }
 0x64f   :  { %v2916_v10 = vpop.f32.mrf.mxu1 }
 0x650   :  { %v2503_v40 = vadd.f32 %v2915_v15, %v2723_v29 }
 0x651   :  { %v2917_v5 = vpop.f32.mrf.mxu1 }
 0x66b   :  { %v2935_v16 = vpop.f32.mrf.mxu1 }
 0x66d   :  { %v2936_v35 = vpop.f32.mrf.mxu1 }
 0x66e   :  { %v2937_v20 = vadd.f32 %v2936_v35, %v2935_v16 }
 0x66f   :  { %v2938_v30 = vpop.f32.mrf.mxu1 }
 0x670   :  { %v2543_v22 = vadd.f32 %v2937_v20, %v2503_v40 }
 0x671   :  { %v2939_v17 = vpop.f32.mrf.mxu1 }
 0x672   :  { %2548 = vst [vmem:[%s4142_s11] sm:$0xff] %v2543_v22 }

</bundles_post_ra>
